<compile_context>
chip_gen: v7x
topology: tpu7x:2x2x1
jax: 0.10.0
libtpu: 0.0.40
codegen_flags: <defaults>
</compile_context>

<pallas_src>
import jax
import jax.numpy as jnp
import numpy as np
from jax.experimental import pallas as pl
from jax.experimental.pallas import tpu as pltpu

# ----- model hyper-parameters (small, consistent with the module __init__) --
LMAX = 2
K = (LMAX + 1) ** 2            # 9  spherical-harmonic coefficients
C = 8                          # sphere_channels == sphere_channels_all
H = 16                         # hidden_channels
NUM_GAUSS = 8                  # edge_attr_dim (distance expansion size)
MAX_ELEM = 10                  # max_num_elements
RES_B, RES_A = 8, 8            # SO3_Grid resolution
G = RES_B * RES_A              # 64 flattened grid points

KC = K * C                     # 72   irrep feature width
KCP = 128                      # lane-dense padded irrep width (multiple of 128)
KH = K * H                     # 144  edge hidden width
GC = G * C                     # 512  grid feature width (already 128-multiple)

MAX_BLOCK_ROWS = 512           # edges / nodes per grid step (few MB of VMEM)


def _round_up(x, m):
    return ((x + m - 1) // m) * m


def _pad_cols(x, to):
    return jnp.pad(x, ((0, 0), (0, to - x.shape[1])))


def _pad_rows(x, to):
    return jnp.pad(x, ((0, to - x.shape[0]), (0, 0)))


# ============================================================================
# Pallas kernels (pure 2-D, lane-dense, batched over rows)
# ============================================================================
def _edge_mlp_kernel(xs_ref, xt_ref, gate_ref, w1k_ref, w2k_ref, o_ref):
    """Edge-frame message MLP for a block of TE edges.

    xs/xt : (TE, KCP)  source/target embeddings, rotated into edge frame,
                       zero-padded 72 -> 128 lanes
    gate  : (TE, KH)   edge scalars tiled over K (broadcast of x_edge)
    w1k   : (KCP, KH)  = kron(I_K, W1) with zero-padded rows
    w2k   : (KH, KCP)  = kron(I_K, W2) with zero-padded cols
    out   : (TE, KCP)  message in edge frame (still to be rotated back)
    """
    w1k = w1k_ref[...]
    gate = gate_ref[...]
    h = jax.nn.silu(
        jnp.dot(xs_ref[...], w1k, preferred_element_type=jnp.float32) * gate)
    h = h + jax.nn.silu(
        jnp.dot(xt_ref[...], w1k, preferred_element_type=jnp.float32) * gate)
    # second channel mix is linear -> sum the two gated branches first
    o_ref[...] = jnp.dot(h, w2k_ref[...], preferred_element_type=jnp.float32)


def _sphere_mlp_kernel(xe_ref, xm_ref, ae_ref, am_ref, w2s_ref, b_ref, o_ref):
    """Fused grid path for a block of TN nodes:
       to_grid + fc1 (fused into A_e/A_m) -> SiLU -> fc2 (kron(I_G, W2)) ->
       SiLU -> fc3 + from_grid (fused into B).

    xe/xm : (TN, KCP)   zero-padded node embedding / aggregated message
    ae/am : (KCP, GC)   A[k*C+c, g*C+c'] = to_grid[g,k] * W1[c, c'] (pad rows)
    w2s   : (GC, GC)    kron(I_G, W2)
    b     : (GC, KCP)   B[g*C+c, k*C+c'] = from_grid[g,k] * W3[c,c'] (pad cols)
    out   : (TN, KCP)
    """
    g = jax.nn.silu(
        jnp.dot(xe_ref[...], ae_ref[...], preferred_element_type=jnp.float32)
        + jnp.dot(xm_ref[...], am_ref[...], preferred_element_type=jnp.float32))
    g = jax.nn.silu(jnp.dot(g, w2s_ref[...], preferred_element_type=jnp.float32))
    o_ref[...] = jnp.dot(g, b_ref[...], preferred_element_type=jnp.float32)


# ============================================================================
# Pallas wrappers (row-blocked grid, lane-dense specs)
# ============================================================================
def _row_blocked_call(kernel, row_inputs, full_inputs, out_cols):
    """Run `kernel` over blocks of rows. row_inputs share the leading row dim;
    full_inputs are small 2-D weights replicated to every block (constant
    block index -> not re-fetched per step)."""
    rows = row_inputs[0].shape[0]
    tr = min(MAX_BLOCK_ROWS, _round_up(rows, 8))
    rows_pad = _round_up(rows, tr)
    if rows_pad != rows:
        row_inputs = [jnp.pad(x, ((0, rows_pad - rows), (0, 0)))
                      for x in row_inputs]

    row_spec = lambda cols: pl.BlockSpec((tr, cols), lambda i: (i, 0))
    full_spec = lambda arr: pl.BlockSpec(arr.shape, lambda i: (0, 0))

    out = pl.pallas_call(
        kernel,
        out_shape=jax.ShapeDtypeStruct((rows_pad, out_cols), jnp.float32),
        grid=(rows_pad // tr,),
        in_specs=[row_spec(x.shape[1]) for x in row_inputs]
                 + [full_spec(w) for w in full_inputs],
        out_specs=row_spec(out_cols),
        compiler_params=pltpu.CompilerParams(
            dimension_semantics=("parallel",)),
    )(*row_inputs, *full_inputs)
    return out[:rows]


def edge_mlp_pallas(xs_rot2d, xt_rot2d, gate2d, w1k, w2k):
    return _row_blocked_call(_edge_mlp_kernel,
                             [xs_rot2d, xt_rot2d, gate2d],
                             [w1k, w2k], out_cols=KCP)


def sphere_mlp_pallas(x_emb2d, x_msg2d, a_emb, a_msg, w2blk, b_out):
    return _row_blocked_call(_sphere_mlp_kernel,
                             [x_emb2d, x_msg2d],
                             [a_emb, a_msg, w2blk, b_out], out_cols=KCP)


# ============================================================================
# Plain-JAX glue (parameter setup, distance expansion, gather/scatter)
# ============================================================================
def init_params(key):
    ks = jax.random.split(key, 10)

    def w(k, shape, scale=None):
        if scale is None:
            scale = 1.0 / np.sqrt(shape[0])
        return jax.random.normal(k, shape, jnp.float32) * scale

    return {
        "src_embed": w(ks[0], (MAX_ELEM, H), 0.1),
        "tgt_embed": w(ks[1], (MAX_ELEM, H), 0.1),
        "w_dist":    w(ks[2], (NUM_GAUSS, H)),
        "w_so2_1":   w(ks[3], (C, H)),
        "w_so2_2":   w(ks[4], (H, C)),
        "to_grid":   w(ks[5], (G, K), 1.0 / np.sqrt(K)),   # SO3_Grid to_grid_mat
        "from_grid": w(ks[6], (G, K), 1.0 / np.sqrt(G)),   # SO3_Grid from_grid_mat
        "w1_sphere": w(ks[7], (2 * C, C)),                 # fc1_sphere (bias=False), (in,out)
        "w2_sphere": w(ks[8], (C, C)),                     # fc2_sphere
        "w3_sphere": w(ks[9], (C, C)),                     # fc3_sphere
    }


def gaussian_smearing(d, num_gaussians=NUM_GAUSS, cutoff=5.0):
    offset = jnp.linspace(0.0, cutoff, num_gaussians)
    coeff = -0.5 / (offset[1] - offset[0]) ** 2
    return jnp.exp(coeff * (d[:, None] - offset[None, :]) ** 2)


def so2_convnet_layer_forward(params, x_emb, atomic_numbers, edge_distance,
                              edge_index, so3_edge_rot, x_irrep_out_old=None,
                              resnet=True):
    N = x_emb.shape[0]
    E = edge_index.shape[1]
    src, tgt = edge_index[0], edge_index[1]

    # -------------------- MessageBlock --------------------
    # TODO(synk): the full eSCN MessageBlock (per-m SO(2) convolutions on
    # Wigner-rotated coefficients + grid-space nonlinearity) is not part of the
    # provided source; this is a simplified but structurally faithful stand-in.
    edge_attr = gaussian_smearing(edge_distance)                        # (E, NUM_GAUSS)
    x_edge = jax.nn.silu(edge_attr @ params["w_dist"]
                         + params["src_embed"][atomic_numbers[src]]
                         + params["tgt_embed"][atomic_numbers[tgt]])    # (E, H)

    # rotate into edge frames (hoisted to one XLA batched einsum — per-edge 9x9
    # matmuls are not useful MXU work inside the kernel)
    xs_rot = jnp.einsum("ekj,ejc->ekc", so3_edge_rot,
                        x_emb[src]).reshape(E, KC)
    xt_rot = jnp.einsum("ekj,ejc->ekc", so3_edge_rot,
                        x_emb[tgt]).reshape(E, KC)
    gate = jnp.tile(x_edge, (1, K))                                      # (E, K*H)

    # block-diagonal channel-mix weights (built once, shared by all blocks);
    # zero-pad the 72-wide irrep dims to 128 so all kernel I/O is lane-dense.
    eye_k = jnp.eye(K, dtype=jnp.float32)
    w1k = _pad_rows(jnp.kron(eye_k, params["w_so2_1"]), KCP)             # (KCP, KH)
    w2k = _pad_cols(jnp.kron(eye_k, params["w_so2_2"]), KCP)             # (KH, KCP)

    m2d = edge_mlp_pallas(_pad_cols(xs_rot, KCP),
                          _pad_cols(xt_rot, KCP),
                          gate, w1k, w2k)[:, :KC]                        # (E, K*C)

    # rotate back (inverse = transpose of orthogonal Wigner rotation) + scatter
    m = jnp.einsum("ejk,ejc->ekc", so3_edge_rot, m2d.reshape(E, K, C))
    x_message = jax.ops.segment_sum(m, tgt, num_segments=N)              # (N, K, C)
    # TODO(synk): fuse gather / rotate-back / segment_sum into the edge kernel
    # via PrefetchScalarGridSpec (edges sorted by target + per-node offsets) to
    # remove the (E,K,C) HBM round-trip; kept in XLA here for robustness.

    # -------------------- grid path (fully fused, lane-dense) -------------
    tg, fg = params["to_grid"], params["from_grid"]
    w1, w2, w3 = params["w1_sphere"], params["w2_sphere"], params["w3_sphere"]
    # A[k*C+c, g*C+c'] = tg[g,k] * W1[c, c']  (to_grid + fc1 fused)
    a_emb = _pad_rows(jnp.einsum("gk,ce->kcge", tg, w1[:C, :]).reshape(KC, GC), KCP)
    a_msg = _pad_rows(jnp.einsum("gk,ce->kcge", tg, w1[C:, :]).reshape(KC, GC), KCP)
    w2blk = jnp.kron(jnp.eye(G, dtype=jnp.float32), w2)                  # (GC, GC)
    # B[g*C+c, k*C+c'] = fg[g,k] * W3[c, c']  (fc3 + from_grid fused)
    b_out = _pad_cols(jnp.einsum("gk,ce->gcke", fg, w3).reshape(GC, KC), KCP)

    out2d = sphere_mlp_pallas(_pad_cols(x_emb.reshape(N, KC), KCP),
                              _pad_cols(x_message.reshape(N, KC), KCP),
                              a_emb, a_msg, w2blk, b_out)[:, :KC]        # (N, K*C)

    x_msg_out = out2d.reshape(N, K, C)
    x_irrep_out = out2d                                                  # .flatten(1, 2)
    if resnet and x_irrep_out_old is not None:
        x_irrep_out = x_irrep_out + x_irrep_out_old
    return x_msg_out, x_irrep_out


# ---------------- pure-JAX reference (same math) for validation -------------
def reference_forward(params, x_emb, atomic_numbers, edge_distance, edge_index,
                      rot, x_old):
    src, tgt = edge_index[0], edge_index[1]
    edge_attr = gaussian_smearing(edge_distance)
    x_edge = jax.nn.silu(edge_attr @ params["w_dist"]
                         + params["src_embed"][atomic_numbers[src]]
                         + params["tgt_embed"][atomic_numbers[tgt]])

    def branch(x):
        xr = jnp.einsum("ekj,ejc->ekc", rot, x)
        h = jax.nn.silu(jnp.einsum("ekc,ch->ekh", xr, params["w_so2_1"])
                        * x_edge[:, None, :])
        return jnp.einsum("ekh,hc->ekc", h, params["w_so2_2"])

    m = branch(x_emb[src]) + branch(x_emb[tgt])
    m = jnp.einsum("ejk,ejc->ekc", rot, m)
    x_message = jax.ops.segment_sum(m, tgt, num_segments=x_emb.shape[0])

    g_e = jnp.einsum("gk,nkc->ngc", params["to_grid"], x_emb)
    g_m = jnp.einsum("gk,nkc->ngc", params["to_grid"], x_message)
    g = jnp.concatenate([g_e, g_m], axis=-1)
    g = jax.nn.silu(g @ params["w1_sphere"])
    g = jax.nn.silu(g @ params["w2_sphere"])
    g = g @ params["w3_sphere"]
    out = jnp.einsum("gk,ngc->nkc", params["from_grid"], g)
    flat = out.reshape(out.shape[0], -1) + x_old
    return out, flat


# ============================================================================
if __name__ == "__main__":
    key = jax.random.PRNGKey(0)
    kp, k1, k2, k3, k4, k5 = jax.random.split(key, 6)
    params = init_params(kp)

    N_nodes, E_edges = 8, 16
    x_emb = jax.random.normal(k1, (N_nodes, K, C), jnp.float32)          # SO3_Embedding.embedding
    atomic_numbers = jax.random.randint(k2, (N_nodes,), 1, MAX_ELEM)     # data.atoms.squeeze()
    edge_index = jax.random.randint(k3, (2, E_edges), 0, N_nodes)        # data.edge_index
    edge_distance = jax.random.uniform(k4, (E_edges,), jnp.float32, 0.5, 4.5)
    # per-edge orthogonal "Wigner" rotations (SO3_edge_rot stand-in)
    rot_raw = jax.random.normal(k5, (E_edges, K, K), jnp.float32)
    so3_edge_rot, _ = jnp.linalg.qr(rot_raw)
    x_irrep_out_old = jax.random.normal(jax.random.PRNGKey(1),
                                        (N_nodes, K * C), jnp.float32)

    fwd = jax.jit(lambda p, xe, an, ed, ei, rot, xold:
                  so2_convnet_layer_forward(p, xe, an, ed, ei, rot, xold,
                                            resnet=True))
    x_message, x_irrep_out = fwd(params, x_emb, atomic_numbers,
                                 edge_distance, edge_index, so3_edge_rot,
                                 x_irrep_out_old)
    jax.block_until_ready((x_message, x_irrep_out))

    ref_msg, ref_out = reference_forward(params, x_emb, atomic_numbers,
                                         edge_distance, edge_index,
                                         so3_edge_rot, x_irrep_out_old)
    np.testing.assert_allclose(np.asarray(x_message), np.asarray(ref_msg),
                               rtol=2e-4, atol=2e-4)
    np.testing.assert_allclose(np.asarray(x_irrep_out), np.asarray(ref_out),
                               rtol=2e-4, atol=2e-4)
    print("KERNEL_OK")
</pallas_src>

<mosaic_0001>
module attributes {stable_mosaic.version = 11 : i64} {
  func.func @_edge_mlp_kernel(%arg0: i32, %arg1: memref<16x128xf32, #tpu.memory_space<vmem>>, %arg2: memref<16x128xf32, #tpu.memory_space<vmem>>, %arg3: memref<16x144xf32, #tpu.memory_space<vmem>>, %arg4: memref<128x144xf32, #tpu.memory_space<vmem>>, %arg5: memref<144x128xf32, #tpu.memory_space<vmem>>, %arg6: memref<16x128xf32, #tpu.memory_space<vmem>>) attributes {dimension_semantics = [#tpu.dimension_semantics<parallel>], iteration_bounds = array<i64: 1>, scalar_prefetch = 0 : i64, scratch_operands = 0 : i64, tpu.core_type = #tpu.core_type<tc>, window_params = [{transform_indices = @transform_0, window_bounds = array<i64: 16, 128>}, {transform_indices = @transform_1, window_bounds = array<i64: 16, 128>}, {transform_indices = @transform_2, window_bounds = array<i64: 16, 144>}, {pipeline_mode = #tpu.pipeline_mode<synchronous>, transform_indices = @transform_3, window_bounds = array<i64: 128, 144>}, {pipeline_mode = #tpu.pipeline_mode<synchronous>, transform_indices = @transform_4, window_bounds = array<i64: 144, 128>}, {transform_indices = @transform_5, window_bounds = array<i64: 16, 128>}]} {
    %c0 = arith.constant 0 : index
    %c0_0 = arith.constant 0 : index
    %0 = vector.load %arg4[%c0, %c0_0] : memref<128x144xf32, #tpu.memory_space<vmem>>, vector<128x144xf32>
    %c0_1 = arith.constant 0 : index
    %c0_2 = arith.constant 0 : index
    %1 = vector.load %arg3[%c0_1, %c0_2] : memref<16x144xf32, #tpu.memory_space<vmem>>, vector<16x144xf32>
    %c0_3 = arith.constant 0 : index
    %c0_4 = arith.constant 0 : index
    %2 = vector.load %arg1[%c0_3, %c0_4] : memref<16x128xf32, #tpu.memory_space<vmem>>, vector<16x128xf32>
    %cst = arith.constant dense<0.000000e+00> : vector<16x144xf32>
    %3 = tpu.matmul %2, %0, %cst {dimension_numbers = #tpu.dot_dimension_numbers<[1], [0], [0], [1], [0, 0, 1, 1], [], []>} : vector<16x128xf32>, vector<128x144xf32>, vector<16x144xf32> -> vector<16x144xf32>
    %4 = arith.mulf %3, %1 : vector<16x144xf32>
    %5 = arith.negf %4 : vector<16x144xf32>
    %6 = math.exp %5 : vector<16x144xf32>
    %cst_5 = arith.constant 1.000000e+00 : f32
    %7 = vector.broadcast %cst_5 : f32 to vector<16x144xf32>
    %8 = arith.addf %7, %6 : vector<16x144xf32>
    %9 = arith.divf %7, %8 : vector<16x144xf32>
    %10 = arith.mulf %4, %9 : vector<16x144xf32>
    %c0_6 = arith.constant 0 : index
    %c0_7 = arith.constant 0 : index
    %11 = vector.load %arg2[%c0_6, %c0_7] : memref<16x128xf32, #tpu.memory_space<vmem>>, vector<16x128xf32>
    %cst_8 = arith.constant dense<0.000000e+00> : vector<16x144xf32>
    %12 = tpu.matmul %11, %0, %cst_8 {dimension_numbers = #tpu.dot_dimension_numbers<[1], [0], [0], [1], [0, 0, 1, 1], [], []>} : vector<16x128xf32>, vector<128x144xf32>, vector<16x144xf32> -> vector<16x144xf32>
    %13 = arith.mulf %12, %1 : vector<16x144xf32>
    %14 = arith.negf %13 : vector<16x144xf32>
    %15 = math.exp %14 : vector<16x144xf32>
    %cst_9 = arith.constant 1.000000e+00 : f32
    %16 = vector.broadcast %cst_9 : f32 to vector<16x144xf32>
    %17 = arith.addf %16, %15 : vector<16x144xf32>
    %18 = arith.divf %16, %17 : vector<16x144xf32>
    %19 = arith.mulf %13, %18 : vector<16x144xf32>
    %20 = arith.addf %10, %19 : vector<16x144xf32>
    %c0_10 = arith.constant 0 : index
    %c0_11 = arith.constant 0 : index
    %21 = vector.load %arg5[%c0_10, %c0_11] : memref<144x128xf32, #tpu.memory_space<vmem>>, vector<144x128xf32>
    %cst_12 = arith.constant dense<0.000000e+00> : vector<16x128xf32>
    %22 = tpu.matmul %20, %21, %cst_12 {dimension_numbers = #tpu.dot_dimension_numbers<[1], [0], [0], [1], [0, 0, 1, 1], [], []>} : vector<16x144xf32>, vector<144x128xf32>, vector<16x128xf32> -> vector<16x128xf32>
    %c0_13 = arith.constant 0 : index
    %c0_14 = arith.constant 0 : index
    %23 = vector.load %arg6[%c0_13, %c0_14] : memref<16x128xf32, #tpu.memory_space<vmem>>, vector<16x128xf32>
    tpu.vector_store %arg6[%c0_13, %c0_14], %22 {strides = array<i32>} : memref<16x128xf32, #tpu.memory_space<vmem>>, vector<16x128xf32>,
    return
  }
  func.func @transform_0(%arg0: i32) -> (i32, i32) {
    %c0_i32 = arith.constant 0 : i32
    %c0_i32_0 = arith.constant 0 : i32
    return %arg0, %c0_i32 : i32, i32
  }
  func.func @transform_1(%arg0: i32) -> (i32, i32) {
    %c0_i32 = arith.constant 0 : i32
    %c0_i32_0 = arith.constant 0 : i32
    return %arg0, %c0_i32 : i32, i32
  }
  func.func @transform_2(%arg0: i32) -> (i32, i32) {
    %c0_i32 = arith.constant 0 : i32
    %c0_i32_0 = arith.constant 0 : i32
    return %arg0, %c0_i32 : i32, i32
  }
  func.func @transform_3(%arg0: i32) -> (i32, i32) {
    %c0_i32 = arith.constant 0 : i32
    %c0_i32_0 = arith.constant 0 : i32
    %c0_i32_1 = arith.constant 0 : i32
    return %c0_i32, %c0_i32_0 : i32, i32
  }
  func.func @transform_4(%arg0: i32) -> (i32, i32) {
    %c0_i32 = arith.constant 0 : i32
    %c0_i32_0 = arith.constant 0 : i32
    %c0_i32_1 = arith.constant 0 : i32
    return %c0_i32, %c0_i32_0 : i32, i32
  }
  func.func @transform_5(%arg0: i32) -> (i32, i32) {
    %c0_i32 = arith.constant 0 : i32
    %c0_i32_0 = arith.constant 0 : i32
    return %arg0, %c0_i32 : i32, i32
  }
}

module attributes {stable_mosaic.version = 11 : i64} {
  func.func @_sphere_mlp_kernel(%arg0: i32, %arg1: memref<8x128xf32, #tpu.memory_space<vmem>>, %arg2: memref<8x128xf32, #tpu.memory_space<vmem>>, %arg3: memref<128x512xf32, #tpu.memory_space<vmem>>, %arg4: memref<128x512xf32, #tpu.memory_space<vmem>>, %arg5: memref<512x512xf32, #tpu.memory_space<vmem>>, %arg6: memref<512x128xf32, #tpu.memory_space<vmem>>, %arg7: memref<8x128xf32, #tpu.memory_space<vmem>>) attributes {dimension_semantics = [#tpu.dimension_semantics<parallel>], iteration_bounds = array<i64: 1>, scalar_prefetch = 0 : i64, scratch_operands = 0 : i64, tpu.core_type = #tpu.core_type<tc>, window_params = [{transform_indices = @transform_0, window_bounds = array<i64: 8, 128>}, {transform_indices = @transform_1, window_bounds = array<i64: 8, 128>}, {pipeline_mode = #tpu.pipeline_mode<synchronous>, transform_indices = @transform_2, window_bounds = array<i64: 128, 512>}, {pipeline_mode = #tpu.pipeline_mode<synchronous>, transform_indices = @transform_3, window_bounds = array<i64: 128, 512>}, {pipeline_mode = #tpu.pipeline_mode<synchronous>, transform_indices = @transform_4, window_bounds = array<i64: 512, 512>}, {pipeline_mode = #tpu.pipeline_mode<synchronous>, transform_indices = @transform_5, window_bounds = array<i64: 512, 128>}, {transform_indices = @transform_6, window_bounds = array<i64: 8, 128>}]} {
    %c0 = arith.constant 0 : index
    %c0_0 = arith.constant 0 : index
    %0 = vector.load %arg1[%c0, %c0_0] : memref<8x128xf32, #tpu.memory_space<vmem>>, vector<8x128xf32>
    %c0_1 = arith.constant 0 : index
    %c0_2 = arith.constant 0 : index
    %1 = vector.load %arg3[%c0_1, %c0_2] : memref<128x512xf32, #tpu.memory_space<vmem>>, vector<128x512xf32>
    %cst = arith.constant dense<0.000000e+00> : vector<8x512xf32>
    %2 = tpu.matmul %0, %1, %cst {dimension_numbers = #tpu.dot_dimension_numbers<[1], [0], [0], [1], [0, 0, 1, 1], [], []>} : vector<8x128xf32>, vector<128x512xf32>, vector<8x512xf32> -> vector<8x512xf32>
    %c0_3 = arith.constant 0 : index
    %c0_4 = arith.constant 0 : index
    %3 = vector.load %arg2[%c0_3, %c0_4] : memref<8x128xf32, #tpu.memory_space<vmem>>, vector<8x128xf32>
    %c0_5 = arith.constant 0 : index
    %c0_6 = arith.constant 0 : index
    %4 = vector.load %arg4[%c0_5, %c0_6] : memref<128x512xf32, #tpu.memory_space<vmem>>, vector<128x512xf32>
    %cst_7 = arith.constant dense<0.000000e+00> : vector<8x512xf32>
    %5 = tpu.matmul %3, %4, %cst_7 {dimension_numbers = #tpu.dot_dimension_numbers<[1], [0], [0], [1], [0, 0, 1, 1], [], []>} : vector<8x128xf32>, vector<128x512xf32>, vector<8x512xf32> -> vector<8x512xf32>
    %6 = arith.addf %2, %5 : vector<8x512xf32>
    %7 = arith.negf %6 : vector<8x512xf32>
    %8 = math.exp %7 : vector<8x512xf32>
    %cst_8 = arith.constant 1.000000e+00 : f32
    %9 = vector.broadcast %cst_8 : f32 to vector<8x512xf32>
    %10 = arith.addf %9, %8 : vector<8x512xf32>
    %11 = arith.divf %9, %10 : vector<8x512xf32>
    %12 = arith.mulf %6, %11 : vector<8x512xf32>
    %c0_9 = arith.constant 0 : index
    %c0_10 = arith.constant 0 : index
    %13 = vector.load %arg5[%c0_9, %c0_10] : memref<512x512xf32, #tpu.memory_space<vmem>>, vector<512x512xf32>
    %cst_11 = arith.constant dense<0.000000e+00> : vector<8x512xf32>
    %14 = tpu.matmul %12, %13, %cst_11 {dimension_numbers = #tpu.dot_dimension_numbers<[1], [0], [0], [1], [0, 0, 1, 1], [], []>} : vector<8x512xf32>, vector<512x512xf32>, vector<8x512xf32> -> vector<8x512xf32>
    %15 = arith.negf %14 : vector<8x512xf32>
    %16 = math.exp %15 : vector<8x512xf32>
    %cst_12 = arith.constant 1.000000e+00 : f32
    %17 = vector.broadcast %cst_12 : f32 to vector<8x512xf32>
    %18 = arith.addf %17, %16 : vector<8x512xf32>
    %19 = arith.divf %17, %18 : vector<8x512xf32>
    %20 = arith.mulf %14, %19 : vector<8x512xf32>
    %c0_13 = arith.constant 0 : index
    %c0_14 = arith.constant 0 : index
    %21 = vector.load %arg6[%c0_13, %c0_14] : memref<512x128xf32, #tpu.memory_space<vmem>>, vector<512x128xf32>
    %cst_15 = arith.constant dense<0.000000e+00> : vector<8x128xf32>
    %22 = tpu.matmul %20, %21, %cst_15 {dimension_numbers = #tpu.dot_dimension_numbers<[1], [0], [0], [1], [0, 0, 1, 1], [], []>} : vector<8x512xf32>, vector<512x128xf32>, vector<8x128xf32> -> vector<8x128xf32>
    %c0_16 = arith.constant 0 : index
    %c0_17 = arith.constant 0 : index
    %23 = vector.load %arg7[%c0_16, %c0_17] : memref<8x128xf32, #tpu.memory_space<vmem>>, vector<8x128xf32>
    tpu.vector_store %arg7[%c0_16, %c0_17], %22 {strides = array<i32>} : memref<8x128xf32, #tpu.memory_space<vmem>>, vector<8x128xf32>,
    return
  }
  func.func @transform_0(%arg0: i32) -> (i32, i32) {
    %c0_i32 = arith.constant 0 : i32
    %c0_i32_0 = arith.constant 0 : i32
    return %arg0, %c0_i32 : i32, i32
  }
  func.func @transform_1(%arg0: i32) -> (i32, i32) {
    %c0_i32 = arith.constant 0 : i32
    %c0_i32_0 = arith.constant 0 : i32
    return %arg0, %c0_i32 : i32, i32
  }
  func.func @transform_2(%arg0: i32) -> (i32, i32) {
    %c0_i32 = arith.constant 0 : i32
    %c0_i32_0 = arith.constant 0 : i32
    %c0_i32_1 = arith.constant 0 : i32
    return %c0_i32, %c0_i32_0 : i32, i32
  }
  func.func @transform_3(%arg0: i32) -> (i32, i32) {
    %c0_i32 = arith.constant 0 : i32
    %c0_i32_0 = arith.constant 0 : i32
    %c0_i32_1 = arith.constant 0 : i32
    return %c0_i32, %c0_i32_0 : i32, i32
  }
  func.func @transform_4(%arg0: i32) -> (i32, i32) {
    %c0_i32 = arith.constant 0 : i32
    %c0_i32_0 = arith.constant 0 : i32
    %c0_i32_1 = arith.constant 0 : i32
    return %c0_i32, %c0_i32_0 : i32, i32
  }
  func.func @transform_5(%arg0: i32) -> (i32, i32) {
    %c0_i32 = arith.constant 0 : i32
    %c0_i32_0 = arith.constant 0 : i32
    %c0_i32_1 = arith.constant 0 : i32
    return %c0_i32, %c0_i32_0 : i32, i32
  }
  func.func @transform_6(%arg0: i32) -> (i32, i32) {
    %c0_i32 = arith.constant 0 : i32
    %c0_i32_0 = arith.constant 0 : i32
    return %arg0, %c0_i32 : i32, i32
  }
}

</mosaic_0001>

<bundles_post_ra>
// kernel: _lambda_.2
= control target key start
LH: loop header
LB: loop body
LE: loop exit
PB: predicated region body
PF: predicated region fallthrough
CT: control target
= control target key end

     0   :  { %v523_v3 = vmov 0.0   ;;  %v524_v56 = vmov 0.0|0.0   ;;  %vm300_vm0 = vcmask 130048   ;;  %s747_s3 = inlined_call_operand.vmem [shape: f32[128,144], index: 3, kind: input, shape index: {}]   ;;  %s748_s0 = inlined_call_operand.vmem [shape: f32[16,128], index: 0, kind: input, shape index: {}]   ;;  %s749_s1 = inlined_call_operand.vmem [shape: f32[16,128], index: 1, kind: input, shape index: {}]   ;;  %s750_s4 = inlined_call_operand.vmem [shape: f32[144,128], index: 4, kind: input, shape index: {}]   ;;  %s751_s2 = inlined_call_operand.vmem [shape: f32[16,144], index: 2, kind: input, shape index: {}]   ;;  %s752_s5 = inlined_call_operand.vmem [shape: f32[16,128], index: 5, kind: output, shape index: {}]  }
   0x1   :  { %v21_v0 = vld [vmem:[%s747_s3 + $0x8] sm:$0xff]  ;;  %v23_v1 = vld [vmem:[%s747_s3 + $0x18] sm:$0xff]  ;;  %v20_v2 = vld [vmem:[%s747_s3] sm:$0xff]  ;;  %122 = vmatprep.mubr.f32.mxu1 %v523_v3  ;;  %462 = vmatprep.subr.bf16.mxu0 %v524_v56 }
   0x2   :  { %v398_v4 = vpack.c.bf16 %v23_v1, %v21_v0  ;;  %v22_v5 = vld [vmem:[%s747_s3 + $0x10] sm:$0xff]  ;;  %v25_v6 = vld [vmem:[%s747_s3 + $0x28] sm:$0xff]  ;;  %v27_v7 = vld [vmem:[%s747_s3 + $0x38] sm:$0xff] }
   0x3   :  { %v400_v8 = vpack.c.bf16 %v22_v5, %v20_v2  ;;  %v402_v9 = vpack.c.bf16 %v27_v7, %v25_v6  ;;  %v24_v10 = vld [vmem:[%s747_s3 + $0x20] sm:$0xff]  ;;  %v26_v11 = vld [vmem:[%s747_s3 + $0x30] sm:$0xff]  ;;  %v29_v12 = vld [vmem:[%s747_s3 + $0x48] sm:$0xff] }
   0x4   :  { %399 = vmatprep.subr.bf16.mxu1 %v398_v4  ;;  %v31_v13 = vld [vmem:[%s747_s3 + $0x58] sm:$0xff]  ;;  %v404_v14 = vpack.c.bf16 %v26_v11, %v24_v10  ;;  %v28_v16 = vld [vmem:[%s747_s3 + $0x40] sm:$0xff]  ;;  %v30_v17 = vld [vmem:[%s747_s3 + $0x50] sm:$0xff] }
   0x5   :  { %401 = vmatpush1.bf16.msra.mxu1 %v400_v8  ;;  %v406_v15 = vpack.c.bf16 %v31_v13, %v29_v12  ;;  %v33_v18 = vld [vmem:[%s747_s3 + $0x68] sm:$0xff]  ;;  %v35_v19 = vld [vmem:[%s747_s3 + $0x78] sm:$0xff]  ;;  %v408_v20 = vpack.c.bf16 %v30_v17, %v28_v16  ;;  %v32_v22 = vld [vmem:[%s747_s3 + $0x60] sm:$0xff] }
   0x6   :  { %403 = vmatprep.subr.bf16.mxu1 %v402_v9  ;;  %v410_v21 = vpack.c.bf16 %v35_v19, %v33_v18  ;;  %v34_v23 = vld [vmem:[%s747_s3 + $0x70] sm:$0xff]  ;;  %v37_v24 = vld [vmem:[%s747_s3 + $0x88] sm:$0xff]  ;;  %v39_v25 = vld [vmem:[%s747_s3 + $0x98] sm:$0xff] }
   0x7   :  { %v412_v26 = vpack.c.bf16 %v34_v23, %v32_v22  ;;  %v414_v27 = vpack.c.bf16 %v39_v25, %v37_v24  ;;  %v36_v28 = vld [vmem:[%s747_s3 + $0x80] sm:$0xff]  ;;  %v38_v29 = vld [vmem:[%s747_s3 + $0x90] sm:$0xff]  ;;  %v41_v30 = vld [vmem:[%s747_s3 + $0xa8] sm:$0xff] }
   0x8   :  { %v43_v31 = vld [vmem:[%s747_s3 + $0xb8] sm:$0xff]  ;;  %v416_v32 = vpack.c.bf16 %v38_v29, %v36_v28  ;;  %v40_v34 = vld [vmem:[%s747_s3 + $0xa0] sm:$0xff]  ;;  %v42_v35 = vld [vmem:[%s747_s3 + $0xb0] sm:$0xff] }
   0x9   :  { %405 = vmatpush1.bf16.msra.mxu1 %v404_v14  ;;  %v418_v33 = vpack.c.bf16 %v43_v31, %v41_v30  ;;  %v45_v36 = vld [vmem:[%s747_s3 + $0xc8] sm:$0xff]  ;;  %v47_v37 = vld [vmem:[%s747_s3 + $0xd8] sm:$0xff]  ;;  %v420_v38 = vpack.c.bf16 %v42_v35, %v40_v34  ;;  %v44_v40 = vld [vmem:[%s747_s3 + $0xc0] sm:$0xff] }
   0xa   :  { %407 = vmatprep.subr.bf16.mxu1 %v406_v15  ;;  %v422_v39 = vpack.c.bf16 %v47_v37, %v45_v36  ;;  %v46_v41 = vld [vmem:[%s747_s3 + $0xd0] sm:$0xff]  ;;  %v49_v42 = vld [vmem:[%s747_s3 + $0xe8] sm:$0xff]  ;;  %v51_v43 = vld [vmem:[%s747_s3 + $0xf8] sm:$0xff] }
   0xb   :  { %v424_v44 = vpack.c.bf16 %v46_v41, %v44_v40  ;;  %v426_v45 = vpack.c.bf16 %v51_v43, %v49_v42  ;;  %v48_v46 = vld [vmem:[%s747_s3 + $0xe0] sm:$0xff]  ;;  %v50_v47 = vld [vmem:[%s747_s3 + $0xf0] sm:$0xff]  ;;  %v57_v50 = vld [vmem:[%s748_s0 + $0x8] sm:$0xff] }
   0xc   :  { %v428_v48 = vpack.c.bf16 %v50_v47, %v48_v46  ;;  %v56_v49 = vld [vmem:[%s748_s0] sm:$0xff]  ;;  %v168_v52 = vld [vmem:[%s749_s1 + $0x8] sm:$0xff]  ;;  %v284_v57 = vld [vmem:[%s750_s4 + $0x10] sm:$0xff] }
   0xd   :  { %409 = vmatpush1.bf16.msra.mxu1 %v408_v20  ;;  %v167_v51 = vld [vmem:[%s749_s1] sm:$0xff]  ;;  %v283_v54 = vld [vmem:[%s750_s4 + $0x8] sm:$0xff]  ;;  %v285_v58 = vld [vmem:[%s750_s4 + $0x18] sm:$0xff] }
   0xe   :  { %411 = vmatprep.subr.bf16.mxu1 %v410_v21  ;;  %v282_v53 = vld [vmem:[%s750_s4] sm:$0xff]  ;;  %v466_v59 = vpack.c.bf16 %v285_v58, %v284_v57  ;;  %v287_v61 = vld [vmem:[%s750_s4 + $0x28] sm:$0xff]  ;;  %v288_v63 = vld [vmem:[%s750_s4 + $0x30] sm:$0xff] }
   0xf   :  { %v463_v55 = vpack.c.bf16 %v283_v54, %v282_v53  ;;  %v286_v60 = vld [vmem:[%s750_s4 + $0x20] sm:$0xff]  ;;  %v289_v0 = vld [vmem:[%s750_s4 + $0x38] sm:$0xff]  ;;  %v292_v5 = vld [vmem:[%s750_s4 + $0x50] sm:$0xff] }
  0x10   :  { %v469_v62 = vpack.c.bf16 %v287_v61, %v286_v60  ;;  %v472_v1 = vpack.c.bf16 %v289_v0, %v288_v63  ;;  %v290_v2 = vld [vmem:[%s750_s4 + $0x40] sm:$0xff]  ;;  %v293_v6 = vld [vmem:[%s750_s4 + $0x58] sm:$0xff]  ;;  %v296_v11 = vld [vmem:[%s750_s4 + $0x70] sm:$0xff] }
  0x11   :  { %413 = vmatpush1.bf16.msra.mxu1 %v412_v26  ;;  %464 = vmatpush1.bf16.msra.mxu0 %v463_v55  ;;  %v478_v7 = vpack.c.bf16 %v293_v6, %v292_v5  ;;  %v297_v12 = vld [vmem:[%s750_s4 + $0x78] sm:$0xff]  ;;  %v53_v22 = vld [vmem:[%s751_s2 + $0x8] sm:$0xff]  ;;  %v54_v25 = vld [vmem:[%s751_s2 + $0x10] sm:$0xff] }
  0x12   :  { %415 = vmatprep.subr.bf16.mxu1 %v414_v27  ;;  %465 = vmatprep.subr.bf16.mxu0 %v524_v56  ;;  %v484_v13 = vpack.c.bf16 %v297_v12, %v296_v11 }
  0x15   :  { %417 = vmatpush1.bf16.msra.mxu1 %v416_v32  ;;  %467 = vmatpush1.bf16.msra.mxu0 %v466_v59 }
  0x16   :  { %419 = vmatprep.subr.bf16.mxu1 %v418_v33  ;;  %468 = vmatprep.subr.bf16.mxu0 %v524_v56 }
  0x19   :  { %421 = vmatpush1.bf16.msra.mxu1 %v420_v38  ;;  %470 = vmatpush1.bf16.msra.mxu0 %v469_v62 }
  0x1a   :  { %423 = vmatprep.subr.bf16.mxu1 %v422_v39  ;;  %471 = vmatprep.subr.bf16.mxu0 %v524_v56 }
  0x1d   :  { %425 = vmatpush1.bf16.msra.mxu1 %v424_v44  ;;  %473 = vmatpush1.bf16.msra.mxu0 %v472_v1 }
  0x1e   :  { %427 = vmatprep.subr.bf16.mxu1 %v426_v45  ;;  %474 = vmatprep.subr.bf16.mxu0 %v524_v56 }
  0x21   :  { %429 = vmatpush1.bf16.msra.mxu1 %v428_v48 }
  0x22   :  { %431 = vmatprep.subr.bf16.mxu1 %v398_v4 }
  0x24   :  { %123 = vmatmul.mubr.f32.vlgmr.msra.gmra.mrb[0].mxu1 %v56_v49 }
  0x25   :  { %433 = vmatpush1.bf16.msra.mxu1 %v400_v8  ;;  %128 = vmatprep.mubr.f32.mxu1 %v523_v3  ;;  %v294_v8 = vld [vmem:[%s750_s4 + $0x60] sm:$0xff] }
  0x26   :  { %435 = vmatprep.subr.bf16.mxu1 %v402_v9  ;;  %v295_v9 = vld [vmem:[%s750_s4 + $0x68] sm:$0xff] }
  0x27   :  { %v481_v10 = vpack.c.bf16 %v295_v9, %v294_v8 }
  0x28   :  { %129 = vmatmul.mubr.f32.gmra.mrb[2].mxu1 %v57_v50 }
  0x29   :  { %437 = vmatpush1.bf16.msra.mxu1 %v404_v14  ;;  %233 = vmatprep.mubr.f32.mxu1 %v523_v3  ;;  %v298_v14 = vld [vmem:[%s750_s4 + $0x80] sm:$0xff] }
  0x2a   :  { %439 = vmatprep.subr.bf16.mxu1 %v406_v15  ;;  %v299_v15 = vld [vmem:[%s750_s4 + $0x88] sm:$0xff] }
  0x2b   :  { %v487_v16 = vpack.c.bf16 %v299_v15, %v298_v14 }
  0x2d   :  { %441 = vmatpush1.bf16.msra.mxu1 %v408_v20 }
  0x2e   :  { %443 = vmatprep.subr.bf16.mxu1 %v410_v21  ;;  %v52_v21 = vld [vmem:[%s751_s2] sm:$0xff] }
  0x31   :  { %445 = vmatpush1.bf16.msra.mxu1 %v412_v26  ;;  %v55_v26 = vld [vmem:[%s751_s2 + $0x18] sm:$0xff] }
  0x32   :  { %447 = vmatprep.subr.bf16.mxu1 %v414_v27 }
  0x35   :  { %449 = vmatpush1.bf16.msra.mxu1 %v416_v32 }
  0x36   :  { %451 = vmatprep.subr.bf16.mxu1 %v418_v33 }
  0x39   :  { %453 = vmatpush1.bf16.msra.mxu1 %v420_v38 }
  0x3a   :  { %455 = vmatprep.subr.bf16.mxu1 %v422_v39 }
  0x3d   :  { %457 = vmatpush1.bf16.msra.mxu1 %v424_v44 }
  0x3e   :  { %459 = vmatprep.subr.bf16.mxu1 %v426_v45 }
  0x41   :  { %461 = vmatpush1.bf16.msra.mxu1 %v428_v48 }
  0x44   :  { %234 = vmatmul.mubr.f32.vlgmr.msra.gmra.mrb[4].mxu1 %v167_v51 }
  0x45   :  { %239 = vmatprep.mubr.f32.mxu1 %v523_v3  ;;  %v291_v3 = vld [vmem:[%s750_s4 + $0x48] sm:$0xff] }
  0x46   :  { %v475_v4 = vpack.c.bf16 %v291_v3, %v290_v2 }
  0x48   :  { %240 = vmatmul.mubr.f32.gmra.mrb[6].mxu1 %v168_v52  ;;  %476 = vmatpush1.bf16.msra.mxu0 %v475_v4 }
  0x49   :  { %477 = vmatprep.subr.bf16.mxu0 %v524_v56 }
  0x4c   :  { %479 = vmatpush1.bf16.msra.mxu0 %v478_v7 }
  0x4d   :  { %480 = vmatprep.subr.bf16.mxu0 %v524_v56 }
  0x50   :  { %482 = vmatpush1.bf16.msra.mxu0 %v481_v10 }
  0x51   :  { %483 = vmatprep.subr.bf16.mxu0 %v524_v56 }
  0x54   :  { %485 = vmatpush1.bf16.msra.mxu0 %v484_v13 }
  0x55   :  { %486 = vmatprep.subr.bf16.mxu0 %v524_v56 }
  0x58   :  { %488 = vmatpush1.bf16.msra.mxu0 %v487_v16 }
  0xf7   :  { %v124_v17 = vpop.f32.mrb[0].mxu1 }
  0xf8   :  { %v126_v18 = vpop.f32.mrb[1].mxu1  ;;  %v135_v23 = vmul.f32 %v124_v17, %v52_v21 }
  0xf9   :  { %v136_v24 = vmul.f32 %v126_v18, %v53_v22 }
  0xfa   :  { %v388_v27 = vmul.f32 -1.442695, %v135_v23 }
  0xfb   :  { %v130_v19 = vpop.f32.mrb[2].mxu1  ;;  %v389_v29 = vmul.f32 -1.442695, %v136_v24 }
  0xfc   :  { %v132_v20 = vpop.f32.mrb[3].mxu1  ;;  %v733_v28 = vmul.f32 %v130_v19, %v54_v25  ;;  %491 = vpow2.f32 %v388_v27 }
  0xfd   :  { %v735_v30 = vmul.f32 %v132_v20, %v55_v26  ;;  %493 = vpow2.f32 %v389_v29 }
  0xfe   :  { %v390_v31 = vmul.f32 -1.442695, %v733_v28 }
  0xff   :  { %v391_v32 = vmul.f32 -1.442695, %v735_v30 }
 0x100   :  { %495 = vpow2.f32 %v390_v31 }
 0x101   :  { %497 = vpow2.f32 %v391_v32 }
 0x106   :  { %v492_v45 = vpop.eup %491 }
 0x107   :  { %v494_v46 = vpop.eup %493  ;;  %v151_v47 = vadd.f32 1.0, %v492_v45 }
 0x108   :  { %v152_v49 = vadd.f32 1.0, %v494_v46 }
 0x10a   :  { %v496_v48 = vpop.eup %495 }
 0x10b   :  { %v498_v50 = vpop.eup %497  ;;  %v153_v53 = vadd.f32 1.0, %v496_v48 }
 0x10c   :  { %v154_v55 = vadd.f32 1.0, %v498_v50 }
 0x117   :  { %v235_v33 = vpop.f32.mrb[4].mxu1 }
 0x118   :  { %v246_v34 = vmul.f32 %v235_v33, %v52_v21  ;;  %v237_v35 = vpop.f32.mrb[5].mxu1 }
 0x119   :  { %v247_v36 = vmul.f32 %v237_v35, %v53_v22 }
 0x11a   :  { %v392_v37 = vmul.f32 -1.442695, %v246_v34 }
 0x11b   :  { %v393_v38 = vmul.f32 -1.442695, %v247_v36  ;;  %v241_v39 = vpop.f32.mrb[6].mxu1 }
 0x11c   :  { %499 = vpow2.f32 %v392_v37  ;;  %v248_v40 = vmul.f32 %v241_v39, %v54_v25  ;;  %v243_v41 = vpop.f32.mrb[7].mxu1 }
 0x11d   :  { %501 = vpow2.f32 %v393_v38  ;;  %v249_v42 = vmul.f32 %v243_v41, %v55_v26 }
 0x11e   :  { %v394_v43 = vmul.f32 -1.442695, %v248_v40 }
 0x11f   :  { %v395_v44 = vmul.f32 -1.442695, %v249_v42 }
 0x120   :  { %503 = vpow2.f32 %v394_v43 }
 0x121   :  { %505 = vpow2.f32 %v395_v44 }
 0x122   :  { %507 = vrcp.f32 %v151_v47 }
 0x123   :  { %509 = vrcp.f32 %v152_v49 }
 0x126   :  { %v500_v51 = vpop.eup %499 }
 0x127   :  { %v502_v52 = vpop.eup %501  ;;  %v262_v54 = vadd.f32 1.0, %v500_v51 }
 0x128   :  { %v263_v56 = vadd.f32 1.0, %v502_v52 }
 0x129   :  { %511 = vrcp.f32 %v262_v54 }
 0x12a   :  { %v504_v57 = vpop.eup %503  ;;  %513 = vrcp.f32 %v263_v56 }
 0x12b   :  { %v506_v58 = vpop.eup %505  ;;  %515 = vrcp.f32 %v153_v53  ;;  %v264_v59 = vadd.f32 1.0, %v504_v57 }
 0x12c   :  { %517 = vrcp.f32 %v154_v55  ;;  %v265_v60 = vadd.f32 1.0, %v506_v58  ;;  %v508_v61 = vpop.eup %507 }
 0x12d   :  { %519 = vrcp.f32 %v264_v59  ;;  %v510_v62 = vpop.eup %509  ;;  %v163_v1 = vmul.f32 %v508_v61, %v135_v23 }
 0x12e   :  { %521 = vrcp.f32 %v265_v60  ;;  %v164_v4 = vmul.f32 %v510_v62, %v136_v24 }
 0x133   :  { %v512_v63 = vpop.eup %511 }
 0x134   :  { %v514_v0 = vpop.eup %513  ;;  %v274_v2 = vmul.f32 %v512_v63, %v246_v34 }
 0x135   :  { %v516_v3 = vpop.eup %515  ;;  %v275_v5 = vmul.f32 %v514_v0, %v247_v36 }
 0x136   :  { %v518_v6 = vpop.eup %517  ;;  %v278_v7 = vadd.f32 %v274_v2, %v163_v1  ;;  %v165_v11 = vmul.f32 %v516_v3, %v733_v28 }
 0x137   :  { %v520_v8 = vpop.eup %519  ;;  %v279_v9 = vadd.f32 %v275_v5, %v164_v4  ;;  %v166_v13 = vmul.f32 %v518_v6, %v735_v30 }
 0x138   :  { %v522_v10 = vpop.eup %521  ;;  %v276_v12 = vmul.f32 %v520_v8, %v248_v40 }
 0x139   :  { %v277_v14 = vmul.f32 %v522_v10, %v249_v42  ;;  %396 = vmatprep.mubr.msk.f32.mxu0 %vm300_vm0, %v279_v9 }
 0x13a   :  { %372 = vmatmul.mubr.f32.vlgmr.msra.gmra.mrb[0].mxu0 %v278_v7  ;;  %v280_v15 = vadd.f32 %v276_v12, %v165_v11 }
 0x13b   :  { %v281_v16 = vadd.f32 %v277_v14, %v166_v13 }
 0x13d   :  { %397 = vmatprep.mubr.msk.f32.mxu0 %vm300_vm0, %v281_v16 }
 0x13e   :  { %377 = vmatmul.mubr.f32.gmra.mrb[2].mxu0 %v280_v15 }
 0x20d   :  { %v373_v17 = vpop.f32.mrb[0].mxu0 }
 0x20e   :  { %382 = vst [vmem:[%s752_s5] sm:$0xff] %v373_v17  ;;  %v375_v18 = vpop.f32.mrb[1].mxu0 }
 0x211   :  { %v378_v19 = vpop.f32.mrb[2].mxu0 }
 0x212   :  { %383 = vst [vmem:[%s752_s5 + $0x8] sm:$0xff] %v378_v19  ;;  %v380_v20 = vpop.f32.mrb[3].mxu0 }

// kernel: _lambda_.3
= control target key start
LH: loop header
LB: loop body
LE: loop exit
PB: predicated region body
PF: predicated region fallthrough
CT: control target
= control target key end

     0   :  { %v1809_v3 = vmov 0.0   ;;  %s3206_s3 = inlined_call_operand.vmem [shape: f32[128,512], index: 3, kind: input, shape index: {}]   ;;  %s3207_s2 = inlined_call_operand.vmem [shape: f32[128,512], index: 2, kind: input, shape index: {}]   ;;  %s3208_s1 = inlined_call_operand.vmem [shape: f32[8,128], index: 1, kind: input, shape index: {}]   ;;  %s3209_s4 = inlined_call_operand.vmem [shape: f32[512,512], index: 4, kind: input, shape index: {}]   ;;  %s3210_s0 = inlined_call_operand.vmem [shape: f32[8,128], index: 0, kind: input, shape index: {}]   ;;  %s3211_s5 = inlined_call_operand.vmem [shape: f32[512,128], index: 5, kind: input, shape index: {}]   ;;  %s3212_s6 = inlined_call_operand.vmem [shape: f32[8,128], index: 6, kind: output, shape index: {}]  }
   0x1   :  { %v90_v0 = vld [vmem:[%s3206_s3 + $0x8] sm:$0xff]  ;;  %v89_v2 = vld [vmem:[%s3206_s3] sm:$0xff]  ;;  %217 = vmatprep.mubr.f32.mxu0 %v1809_v3  ;;  %288 = vmatprep.mubr.f32.mxu1 %v1809_v3  ;;  %v92_v12 = vld [vmem:[%s3206_s3 + $0x18] sm:$0xff] }
   0x2   :  { %v94_v1 = vld [vmem:[%s3206_s3 + $0x28] sm:$0xff]  ;;  %v93_v5 = vld [vmem:[%s3206_s3 + $0x20] sm:$0xff]  ;;  %v96_v13 = vld [vmem:[%s3206_s3 + $0x38] sm:$0xff] }
   0x3   :  { %v1320_v4 = vpack.c.bf16 %v94_v1, %v90_v0  ;;  %v98_v6 = vld [vmem:[%s3206_s3 + $0x48] sm:$0xff]  ;;  %v1322_v8 = vpack.c.bf16 %v93_v5, %v89_v2  ;;  %v97_v10 = vld [vmem:[%s3206_s3 + $0x40] sm:$0xff]  ;;  %v91_v14 = vld [vmem:[%s3206_s3 + $0x10] sm:$0xff]  ;;  %v1352_v17 = vpack.c.bf16 %v96_v13, %v92_v12 }
   0x4   :  { %v102_v7 = vld [vmem:[%s3206_s3 + $0x68] sm:$0xff]  ;;  %v101_v11 = vld [vmem:[%s3206_s3 + $0x60] sm:$0xff]  ;;  %v95_v15 = vld [vmem:[%s3206_s3 + $0x30] sm:$0xff] }
   0x5   :  { %v1324_v9 = vpack.c.bf16 %v102_v7, %v98_v6  ;;  %1321 = vmatprep.subr.bf16.mxu0 %v1320_v4  ;;  %v1326_v16 = vpack.c.bf16 %v101_v11, %v97_v10  ;;  %v1354_v18 = vpack.c.bf16 %v95_v15, %v91_v14  ;;  %v106_v19 = vld [vmem:[%s3206_s3 + $0x88] sm:$0xff]  ;;  %v105_v21 = vld [vmem:[%s3206_s3 + $0x80] sm:$0xff]  ;;  %v100_v24 = vld [vmem:[%s3206_s3 + $0x58] sm:$0xff]  ;;  %1353 = vmatprep.subr.bf16.mxu1 %v1352_v17 }
   0x6   :  { %1323 = vmatpush1.bf16.msra.mxu0 %v1322_v8  ;;  %v110_v20 = vld [vmem:[%s3206_s3 + $0xa8] sm:$0xff]  ;;  %v109_v23 = vld [vmem:[%s3206_s3 + $0xa0] sm:$0xff]  ;;  %v104_v25 = vld [vmem:[%s3206_s3 + $0x78] sm:$0xff] }
   0x7   :  { %1325 = vmatprep.subr.bf16.mxu0 %v1324_v9  ;;  %v1328_v22 = vpack.c.bf16 %v110_v20, %v106_v19  ;;  %v1356_v26 = vpack.c.bf16 %v104_v25, %v100_v24  ;;  %v99_v27 = vld [vmem:[%s3206_s3 + $0x50] sm:$0xff]  ;;  %v114_v29 = vld [vmem:[%s3206_s3 + $0xc8] sm:$0xff]  ;;  %1355 = vmatpush1.bf16.msra.mxu1 %v1354_v18  ;;  %v1330_v32 = vpack.c.bf16 %v109_v23, %v105_v21  ;;  %v108_v33 = vld [vmem:[%s3206_s3 + $0x98] sm:$0xff] }
   0x8   :  { %v103_v28 = vld [vmem:[%s3206_s3 + $0x70] sm:$0xff]  ;;  %v118_v31 = vld [vmem:[%s3206_s3 + $0xe8] sm:$0xff]  ;;  %v112_v34 = vld [vmem:[%s3206_s3 + $0xb8] sm:$0xff] }
   0x9   :  { %v1358_v30 = vpack.c.bf16 %v103_v28, %v99_v27  ;;  %1357 = vmatprep.subr.bf16.mxu1 %v1356_v26  ;;  %v107_v35 = vld [vmem:[%s3206_s3 + $0x90] sm:$0xff]  ;;  %v1332_v36 = vpack.c.bf16 %v118_v31, %v114_v29  ;;  %v113_v37 = vld [vmem:[%s3206_s3 + $0xc0] sm:$0xff]  ;;  %v1360_v39 = vpack.c.bf16 %v112_v34, %v108_v33  ;;  %v122_v41 = vld [vmem:[%s3206_s3 + $0x108] sm:$0xff] }
   0xa   :  { %1327 = vmatpush1.bf16.msra.mxu0 %v1326_v16  ;;  %v117_v38 = vld [vmem:[%s3206_s3 + $0xe0] sm:$0xff]  ;;  %v111_v40 = vld [vmem:[%s3206_s3 + $0xb0] sm:$0xff]  ;;  %v126_v42 = vld [vmem:[%s3206_s3 + $0x128] sm:$0xff] }
   0xb   :  { %1329 = vmatprep.subr.bf16.mxu0 %v1328_v22  ;;  %v116_v43 = vld [vmem:[%s3206_s3 + $0xd8] sm:$0xff]  ;;  %1359 = vmatpush1.bf16.msra.mxu1 %v1358_v30  ;;  %v1362_v44 = vpack.c.bf16 %v111_v40, %v107_v35  ;;  %v1334_v46 = vpack.c.bf16 %v117_v38, %v113_v37  ;;  %v121_v47 = vld [vmem:[%s3206_s3 + $0x100] sm:$0xff]  ;;  %v115_v49 = vld [vmem:[%s3206_s3 + $0xd0] sm:$0xff]  ;;  %v1336_v51 = vpack.c.bf16 %v126_v42, %v122_v41 }
   0xc   :  { %v120_v45 = vld [vmem:[%s3206_s3 + $0xf8] sm:$0xff]  ;;  %1361 = vmatprep.subr.bf16.mxu1 %v1360_v39  ;;  %v119_v50 = vld [vmem:[%s3206_s3 + $0xf0] sm:$0xff]  ;;  %v125_v52 = vld [vmem:[%s3206_s3 + $0x120] sm:$0xff] }
   0xd   :  { %v1364_v48 = vpack.c.bf16 %v120_v45, %v116_v43  ;;  %v124_v53 = vld [vmem:[%s3206_s3 + $0x118] sm:$0xff]  ;;  %v130_v55 = vld [vmem:[%s3206_s3 + $0x148] sm:$0xff]  ;;  %v1366_v57 = vpack.c.bf16 %v119_v50, %v115_v49  ;;  %v1338_v58 = vpack.c.bf16 %v125_v52, %v121_v47  ;;  %v129_v59 = vld [vmem:[%s3206_s3 + $0x140] sm:$0xff] }
   0xe   :  { %1331 = vmatpush1.bf16.msra.mxu0 %v1330_v32  ;;  %v128_v54 = vld [vmem:[%s3206_s3 + $0x138] sm:$0xff]  ;;  %v134_v56 = vld [vmem:[%s3206_s3 + $0x168] sm:$0xff]  ;;  %v123_v61 = vld [vmem:[%s3206_s3 + $0x110] sm:$0xff] }
   0xf   :  { %1333 = vmatprep.subr.bf16.mxu0 %v1332_v36  ;;  %1363 = vmatpush1.bf16.msra.mxu1 %v1362_v44  ;;  %v1368_v60 = vpack.c.bf16 %v128_v54, %v124_v53  ;;  %v127_v62 = vld [vmem:[%s3206_s3 + $0x130] sm:$0xff]  ;;  %v1340_v63 = vpack.c.bf16 %v134_v56, %v130_v55  ;;  %v133_v0 = vld [vmem:[%s3206_s3 + $0x160] sm:$0xff]  ;;  %v132_v1 = vld [vmem:[%s3206_s3 + $0x158] sm:$0xff] }
  0x10   :  { %1365 = vmatprep.subr.bf16.mxu1 %v1364_v48  ;;  %v136_v2 = vld [vmem:[%s3206_s3 + $0x178] sm:$0xff]  ;;  %v138_v4 = vld [vmem:[%s3206_s3 + $0x188] sm:$0xff]  ;;  %v1370_v6 = vpack.c.bf16 %v127_v62, %v123_v61  ;;  %v1342_v7 = vpack.c.bf16 %v133_v0, %v129_v59  ;;  %v137_v8 = vld [vmem:[%s3206_s3 + $0x180] sm:$0xff] }
  0x11   :  { %v142_v5 = vld [vmem:[%s3206_s3 + $0x1a8] sm:$0xff]  ;;  %v1372_v9 = vpack.c.bf16 %v136_v2, %v132_v1  ;;  %v131_v10 = vld [vmem:[%s3206_s3 + $0x150] sm:$0xff]  ;;  %v141_v13 = vld [vmem:[%s3206_s3 + $0x1a0] sm:$0xff] }
  0x12   :  { %1335 = vmatpush1.bf16.msra.mxu0 %v1334_v46  ;;  %v135_v11 = vld [vmem:[%s3206_s3 + $0x170] sm:$0xff]  ;;  %v1344_v12 = vpack.c.bf16 %v142_v5, %v138_v4  ;;  %v140_v14 = vld [vmem:[%s3206_s3 + $0x198] sm:$0xff]  ;;  %v146_v16 = vld [vmem:[%s3206_s3 + $0x1c8] sm:$0xff]  ;;  %v1346_v19 = vpack.c.bf16 %v141_v13, %v137_v8 }
  0x13   :  { %1337 = vmatprep.subr.bf16.mxu0 %v1336_v51  ;;  %1367 = vmatpush1.bf16.msra.mxu1 %v1366_v57  ;;  %v144_v15 = vld [vmem:[%s3206_s3 + $0x1b8] sm:$0xff]  ;;  %v150_v17 = vld [vmem:[%s3206_s3 + $0x1e8] sm:$0xff]  ;;  %v1374_v18 = vpack.c.bf16 %v135_v11, %v131_v10  ;;  %v145_v20 = vld [vmem:[%s3206_s3 + $0x1c0] sm:$0xff] }
  0x14   :  { %1369 = vmatprep.subr.bf16.mxu1 %v1368_v60  ;;  %v1376_v21 = vpack.c.bf16 %v144_v15, %v140_v14  ;;  %v139_v22 = vld [vmem:[%s3206_s3 + $0x190] sm:$0xff]  ;;  %v1348_v24 = vpack.c.bf16 %v150_v17, %v146_v16  ;;  %v149_v25 = vld [vmem:[%s3206_s3 + $0x1e0] sm:$0xff]  ;;  %v148_v26 = vld [vmem:[%s3206_s3 + $0x1d8] sm:$0xff] }
  0x15   :  { %v143_v23 = vld [vmem:[%s3206_s3 + $0x1b0] sm:$0xff]  ;;  %v152_v27 = vld [vmem:[%s3206_s3 + $0x1f8] sm:$0xff]  ;;  %v25_v28 = vld [vmem:[%s3207_s2 + $0x8] sm:$0xff]  ;;  %v1350_v31 = vpack.c.bf16 %v149_v25, %v145_v20 }
  0x16   :  { %1339 = vmatpush1.bf16.msra.mxu0 %v1338_v58  ;;  %v29_v29 = vld [vmem:[%s3207_s2 + $0x28] sm:$0xff]  ;;  %v1378_v30 = vpack.c.bf16 %v143_v23, %v139_v22  ;;  %v1380_v32 = vpack.c.bf16 %v152_v27, %v148_v26  ;;  %v24_v33 = vld [vmem:[%s3207_s2] sm:$0xff]  ;;  %v147_v34 = vld [vmem:[%s3206_s3 + $0x1d0] sm:$0xff] }
  0x17   :  { %1341 = vmatprep.subr.bf16.mxu0 %v1340_v63  ;;  %1371 = vmatpush1.bf16.msra.mxu1 %v1370_v6  ;;  %v151_v35 = vld [vmem:[%s3206_s3 + $0x1f0] sm:$0xff]  ;;  %v1384_v36 = vpack.c.bf16 %v29_v29, %v25_v28  ;;  %v28_v37 = vld [vmem:[%s3207_s2 + $0x20] sm:$0xff]  ;;  %v27_v38 = vld [vmem:[%s3207_s2 + $0x18] sm:$0xff] }
  0x18   :  { %1373 = vmatprep.subr.bf16.mxu1 %v1372_v9  ;;  %v31_v39 = vld [vmem:[%s3207_s2 + $0x38] sm:$0xff]  ;;  %v33_v40 = vld [vmem:[%s3207_s2 + $0x48] sm:$0xff]  ;;  %v88_v42 = vld [vmem:[%s3208_s1] sm:$0xff]  ;;  %v1382_v43 = vpack.c.bf16 %v151_v35, %v147_v34  ;;  %v1386_v44 = vpack.c.bf16 %v28_v37, %v24_v33 }
  0x19   :  { %v37_v41 = vld [vmem:[%s3207_s2 + $0x68] sm:$0xff]  ;;  %v32_v45 = vld [vmem:[%s3207_s2 + $0x40] sm:$0xff]  ;;  %v1416_v46 = vpack.c.bf16 %v31_v39, %v27_v38  ;;  %v26_v47 = vld [vmem:[%s3207_s2 + $0x10] sm:$0xff] }
  0x1a   :  { %1343 = vmatpush1.bf16.msra.mxu0 %v1342_v7  ;;  %v30_v48 = vld [vmem:[%s3207_s2 + $0x30] sm:$0xff]  ;;  %v1388_v49 = vpack.c.bf16 %v37_v41, %v33_v40  ;;  %v36_v50 = vld [vmem:[%s3207_s2 + $0x60] sm:$0xff]  ;;  %v35_v51 = vld [vmem:[%s3207_s2 + $0x58] sm:$0xff] }
  0x1b   :  { %1345 = vmatprep.subr.bf16.mxu0 %v1344_v12  ;;  %1375 = vmatpush1.bf16.msra.mxu1 %v1374_v18  ;;  %v39_v52 = vld [vmem:[%s3207_s2 + $0x78] sm:$0xff]  ;;  %v41_v53 = vld [vmem:[%s3207_s2 + $0x88] sm:$0xff]  ;;  %v1418_v55 = vpack.c.bf16 %v30_v48, %v26_v47  ;;  %v1390_v56 = vpack.c.bf16 %v36_v50, %v32_v45  ;;  %v40_v57 = vld [vmem:[%s3207_s2 + $0x80] sm:$0xff] }
  0x1c   :  { %1377 = vmatprep.subr.bf16.mxu1 %v1376_v21  ;;  %v45_v54 = vld [vmem:[%s3207_s2 + $0xa8] sm:$0xff]  ;;  %v1420_v58 = vpack.c.bf16 %v39_v52, %v35_v51  ;;  %v34_v59 = vld [vmem:[%s3207_s2 + $0x50] sm:$0xff]  ;;  %v44_v62 = vld [vmem:[%s3207_s2 + $0xa0] sm:$0xff] }
  0x1d   :  { %v38_v60 = vld [vmem:[%s3207_s2 + $0x70] sm:$0xff]  ;;  %v1392_v61 = vpack.c.bf16 %v45_v54, %v41_v53  ;;  %v43_v63 = vld [vmem:[%s3207_s2 + $0x98] sm:$0xff]  ;;  %v49_v1 = vld [vmem:[%s3207_s2 + $0xc8] sm:$0xff]  ;;  %v1394_v5 = vpack.c.bf16 %v44_v62, %v40_v57 }
  0x1e   :  { %1347 = vmatpush1.bf16.msra.mxu0 %v1346_v19  ;;  %v47_v0 = vld [vmem:[%s3207_s2 + $0xb8] sm:$0xff]  ;;  %v53_v2 = vld [vmem:[%s3207_s2 + $0xe8] sm:$0xff]  ;;  %v1422_v4 = vpack.c.bf16 %v38_v60, %v34_v59  ;;  %v48_v6 = vld [vmem:[%s3207_s2 + $0xc0] sm:$0xff] }
  0x1f   :  { %1349 = vmatprep.subr.bf16.mxu0 %v1348_v24  ;;  %1379 = vmatpush1.bf16.msra.mxu1 %v1378_v30  ;;  %v1424_v7 = vpack.c.bf16 %v47_v0, %v43_v63  ;;  %v42_v8 = vld [vmem:[%s3207_s2 + $0x90] sm:$0xff]  ;;  %v1396_v10 = vpack.c.bf16 %v53_v2, %v49_v1  ;;  %v51_v11 = vld [vmem:[%s3207_s2 + $0xd8] sm:$0xff]  ;;  %v57_v13 = vld [vmem:[%s3207_s2 + $0x108] sm:$0xff] }
  0x20   :  { %1381 = vmatprep.subr.bf16.mxu1 %v1380_v32  ;;  %v46_v9 = vld [vmem:[%s3207_s2 + $0xb0] sm:$0xff]  ;;  %v55_v12 = vld [vmem:[%s3207_s2 + $0xf8] sm:$0xff]  ;;  %v61_v14 = vld [vmem:[%s3207_s2 + $0x128] sm:$0xff] }
  0x21   :  { %v1426_v15 = vpack.c.bf16 %v46_v9, %v42_v8  ;;  %v56_v17 = vld [vmem:[%s3207_s2 + $0x100] sm:$0xff]  ;;  %v1428_v18 = vpack.c.bf16 %v55_v12, %v51_v11  ;;  %v50_v19 = vld [vmem:[%s3207_s2 + $0xd0] sm:$0xff]  ;;  %v1400_v21 = vpack.c.bf16 %v61_v14, %v57_v13  ;;  %v59_v23 = vld [vmem:[%s3207_s2 + $0x118] sm:$0xff] }
  0x22   :  { %1351 = vmatpush1.bf16.msra.mxu0 %v1350_v31  ;;  %v54_v20 = vld [vmem:[%s3207_s2 + $0xf0] sm:$0xff]  ;;  %v60_v22 = vld [vmem:[%s3207_s2 + $0x120] sm:$0xff]  ;;  %v63_v24 = vld [vmem:[%s3207_s2 + $0x138] sm:$0xff] }
  0x23   :  { %1385 = vmatprep.subr.bf16.mxu0 %v1384_v36  ;;  %1383 = vmatpush1.bf16.msra.mxu1 %v1382_v43  ;;  %v65_v25 = vld [vmem:[%s3207_s2 + $0x148] sm:$0xff]  ;;  %v1430_v27 = vpack.c.bf16 %v54_v20, %v50_v19  ;;  %v1402_v28 = vpack.c.bf16 %v60_v22, %v56_v17  ;;  %v64_v29 = vld [vmem:[%s3207_s2 + $0x140] sm:$0xff]  ;;  %v1432_v30 = vpack.c.bf16 %v63_v24, %v59_v23  ;;  %v58_v31 = vld [vmem:[%s3207_s2 + $0x110] sm:$0xff] }
  0x24   :  { %1417 = vmatprep.subr.bf16.mxu1 %v1416_v46  ;;  %v69_v26 = vld [vmem:[%s3207_s2 + $0x168] sm:$0xff]  ;;  %v62_v32 = vld [vmem:[%s3207_s2 + $0x130] sm:$0xff]  ;;  %v68_v34 = vld [vmem:[%s3207_s2 + $0x160] sm:$0xff] }
  0x25   :  { %218 = vmatmul.mubr.f32.vlgmr.msra.gmra.mrb[0].mxu0 %v88_v42  ;;  %v1404_v33 = vpack.c.bf16 %v69_v26, %v65_v25  ;;  %v67_v35 = vld [vmem:[%s3207_s2 + $0x158] sm:$0xff]  ;;  %v73_v37 = vld [vmem:[%s3207_s2 + $0x188] sm:$0xff]  ;;  %v1434_v39 = vpack.c.bf16 %v62_v32, %v58_v31  ;;  %v1406_v40 = vpack.c.bf16 %v68_v34, %v64_v29  ;;  %v72_v41 = vld [vmem:[%s3207_s2 + $0x180] sm:$0xff] }
  0x26   :  { %1387 = vmatpush1.bf16.msra.mxu0 %v1386_v44  ;;  %359 = vmatprep.mubr.f32.mxu0 %v1809_v3  ;;  %v71_v36 = vld [vmem:[%s3207_s2 + $0x178] sm:$0xff]  ;;  %v77_v38 = vld [vmem:[%s3207_s2 + $0x1a8] sm:$0xff]  ;;  %v66_v43 = vld [vmem:[%s3207_s2 + $0x150] sm:$0xff] }
  0x27   :  { %1389 = vmatprep.subr.bf16.mxu0 %v1388_v49  ;;  %289 = vmatmul.mubr.f32.vlgmr.msra.gmra.mrb[0].mxu1 %v88_v42  ;;  %v1436_v42 = vpack.c.bf16 %v71_v36, %v67_v35  ;;  %v70_v44 = vld [vmem:[%s3207_s2 + $0x170] sm:$0xff]  ;;  %v1408_v45 = vpack.c.bf16 %v77_v38, %v73_v37  ;;  %v76_v46 = vld [vmem:[%s3207_s2 + $0x1a0] sm:$0xff]  ;;  %v75_v47 = vld [vmem:[%s3207_s2 + $0x198] sm:$0xff] }
  0x28   :  { %1419 = vmatpush1.bf16.msra.mxu1 %v1418_v55  ;;  %430 = vmatprep.mubr.f32.mxu1 %v1809_v3  ;;  %v52_v3 = vld [vmem:[%s3207_s2 + $0xe0] sm:$0xff]  ;;  %v79_v48 = vld [vmem:[%s3207_s2 + $0x1b8] sm:$0xff]  ;;  %v81_v49 = vld [vmem:[%s3207_s2 + $0x1c8] sm:$0xff]  ;;  %v1438_v51 = vpack.c.bf16 %v70_v44, %v66_v43  ;;  %v1410_v52 = vpack.c.bf16 %v76_v46, %v72_v41 }
  0x29   :  { %1421 = vmatprep.subr.bf16.mxu1 %v1420_v58  ;;  %v1398_v16 = vpack.c.bf16 %v52_v3, %v48_v6  ;;  %v85_v50 = vld [vmem:[%s3207_s2 + $0x1e8] sm:$0xff]  ;;  %v80_v53 = vld [vmem:[%s3207_s2 + $0x1c0] sm:$0xff]  ;;  %v1440_v54 = vpack.c.bf16 %v79_v48, %v75_v47  ;;  %v74_v55 = vld [vmem:[%s3207_s2 + $0x190] sm:$0xff] }
  0x2a   :  { %1391 = vmatpush1.bf16.msra.mxu0 %v1390_v56  ;;  %v78_v56 = vld [vmem:[%s3207_s2 + $0x1b0] sm:$0xff]  ;;  %v1412_v57 = vpack.c.bf16 %v85_v50, %v81_v49  ;;  %v84_v58 = vld [vmem:[%s3207_s2 + $0x1e0] sm:$0xff]  ;;  %v83_v59 = vld [vmem:[%s3207_s2 + $0x1d8] sm:$0xff] }
  0x2b   :  { %1393 = vmatprep.subr.bf16.mxu0 %v1392_v61  ;;  %v87_v60 = vld [vmem:[%s3207_s2 + $0x1f8] sm:$0xff]  ;;  %v466_v61 = vld [vmem:[%s3209_s4 + $0x8] sm:$0xff]  ;;  %v1442_v63 = vpack.c.bf16 %v78_v56, %v74_v55  ;;  %v1414_v0 = vpack.c.bf16 %v84_v58, %v80_v53  ;;  %v82_v2 = vld [vmem:[%s3207_s2 + $0x1d0] sm:$0xff] }
  0x2c   :  { %1423 = vmatpush1.bf16.msra.mxu1 %v1422_v4  ;;  %v470_v62 = vld [vmem:[%s3209_s4 + $0x28] sm:$0xff]  ;;  %v1444_v1 = vpack.c.bf16 %v87_v60, %v83_v59  ;;  %v86_v4 = vld [vmem:[%s3207_s2 + $0x1f0] sm:$0xff]  ;;  %v465_v8 = vld [vmem:[%s3209_s4] sm:$0xff] }
  0x2d   :  { %1425 = vmatprep.subr.bf16.mxu1 %v1424_v7  ;;  %v1448_v6 = vpack.c.bf16 %v470_v62, %v466_v61  ;;  %v472_v7 = vld [vmem:[%s3209_s4 + $0x38] sm:$0xff]  ;;  %v469_v9 = vld [vmem:[%s3209_s4 + $0x20] sm:$0xff]  ;;  %v478_v3 = vld [vmem:[%s3209_s4 + $0x68] sm:$0xff]  ;;  %v1446_v12 = vpack.c.bf16 %v86_v4, %v82_v2 }
  0x2e   :  { %1395 = vmatpush1.bf16.msra.mxu0 %v1394_v5  ;;  %v468_v5 = vld [vmem:[%s3209_s4 + $0x18] sm:$0xff]  ;;  %v23_v11 = vld [vmem:[%s3210_s0] sm:$0xff]  ;;  %v1450_v14 = vpack.c.bf16 %v469_v9, %v465_v8  ;;  %v482_v22 = vld [vmem:[%s3209_s4 + $0x88] sm:$0xff] }
  0x2f   :  { %1397 = vmatprep.subr.bf16.mxu0 %v1396_v10  ;;  %v474_v10 = vld [vmem:[%s3209_s4 + $0x48] sm:$0xff]  ;;  %v1576_v13 = vpack.c.bf16 %v472_v7, %v468_v5  ;;  %v476_v17 = vld [vmem:[%s3209_s4 + $0x58] sm:$0xff]  ;;  %v473_v20 = vld [vmem:[%s3209_s4 + $0x40] sm:$0xff] }
  0x30   :  { %1427 = vmatpush1.bf16.msra.mxu1 %v1426_v15  ;;  %v467_v15 = vld [vmem:[%s3209_s4 + $0x10] sm:$0xff]  ;;  %v480_v19 = vld [vmem:[%s3209_s4 + $0x78] sm:$0xff]  ;;  %v486_v23 = vld [vmem:[%s3209_s4 + $0xa8] sm:$0xff] }
  0x31   :  { %1429 = vmatprep.subr.bf16.mxu1 %v1428_v18  ;;  %v1452_v18 = vpack.c.bf16 %v478_v3, %v474_v10  ;;  %v1580_v25 = vpack.c.bf16 %v480_v19, %v476_v17  ;;  %v484_v29 = vld [vmem:[%s3209_s4 + $0x98] sm:$0xff]  ;;  %v481_v32 = vld [vmem:[%s3209_s4 + $0x80] sm:$0xff]  ;;  %v490_v34 = vld [vmem:[%s3209_s4 + $0xc8] sm:$0xff] }
  0x32   :  { %1399 = vmatpush1.bf16.msra.mxu0 %v1398_v16  ;;  %v471_v16 = vld [vmem:[%s3209_s4 + $0x30] sm:$0xff]  ;;  %v488_v31 = vld [vmem:[%s3209_s4 + $0xb8] sm:$0xff]  ;;  %v494_v35 = vld [vmem:[%s3209_s4 + $0xe8] sm:$0xff] }
  0x33   :  { %1401 = vmatprep.subr.bf16.mxu0 %v1400_v21  ;;  %v477_v21 = vld [vmem:[%s3209_s4 + $0x60] sm:$0xff]  ;;  %v1578_v24 = vpack.c.bf16 %v471_v16, %v467_v15  ;;  %v1584_v37 = vpack.c.bf16 %v488_v31, %v484_v29  ;;  %v492_v41 = vld [vmem:[%s3209_s4 + $0xd8] sm:$0xff]  ;;  %v498_v46 = vld [vmem:[%s3209_s4 + $0x108] sm:$0xff] }
  0x34   :  { %1431 = vmatpush1.bf16.msra.mxu1 %v1430_v27  ;;  %v1454_v26 = vpack.c.bf16 %v477_v21, %v473_v20  ;;  %v475_v27 = vld [vmem:[%s3209_s4 + $0x50] sm:$0xff]  ;;  %v496_v43 = vld [vmem:[%s3209_s4 + $0xf8] sm:$0xff]  ;;  %v489_v44 = vld [vmem:[%s3209_s4 + $0xc0] sm:$0xff] }
  0x35   :  { %1433 = vmatprep.subr.bf16.mxu1 %v1432_v30  ;;  %v1456_v30 = vpack.c.bf16 %v486_v23, %v482_v22  ;;  %v502_v47 = vld [vmem:[%s3209_s4 + $0x128] sm:$0xff]  ;;  %v1588_v49 = vpack.c.bf16 %v496_v43, %v492_v41  ;;  %v500_v53 = vld [vmem:[%s3209_s4 + $0x118] sm:$0xff]  ;;  %v497_v56 = vld [vmem:[%s3209_s4 + $0x100] sm:$0xff] }
  0x36   :  { %1403 = vmatpush1.bf16.msra.mxu0 %v1402_v28  ;;  %v479_v28 = vld [vmem:[%s3209_s4 + $0x70] sm:$0xff]  ;;  %v504_v55 = vld [vmem:[%s3209_s4 + $0x138] sm:$0xff]  ;;  %v506_v58 = vld [vmem:[%s3209_s4 + $0x148] sm:$0xff] }
  0x37   :  { %1405 = vmatprep.subr.bf16.mxu0 %v1404_v33  ;;  %v485_v33 = vld [vmem:[%s3209_s4 + $0xa0] sm:$0xff]  ;;  %v1582_v36 = vpack.c.bf16 %v479_v28, %v475_v27  ;;  %v510_v59 = vld [vmem:[%s3209_s4 + $0x168] sm:$0xff]  ;;  %v1592_v61 = vpack.c.bf16 %v504_v55, %v500_v53  ;;  %v512_v4 = vld [vmem:[%s3209_s4 + $0x178] sm:$0xff] }
  0x38   :  { %1435 = vmatpush1.bf16.msra.mxu1 %v1434_v39  ;;  %v1458_v38 = vpack.c.bf16 %v485_v33, %v481_v32  ;;  %v483_v39 = vld [vmem:[%s3209_s4 + $0x90] sm:$0xff]  ;;  %v1468_v2 = vpack.c.bf16 %v510_v59, %v506_v58  ;;  %v505_v5 = vld [vmem:[%s3209_s4 + $0x140] sm:$0xff]  ;;  %v514_v7 = vld [vmem:[%s3209_s4 + $0x188] sm:$0xff] }
  0x39   :  { %1437 = vmatprep.subr.bf16.mxu1 %v1436_v42  ;;  %v1460_v42 = vpack.c.bf16 %v494_v35, %v490_v34  ;;  %v518_v8 = vld [vmem:[%s3209_s4 + $0x1a8] sm:$0xff]  ;;  %v520_v15 = vld [vmem:[%s3209_s4 + $0x1b8] sm:$0xff]  ;;  %v513_v16 = vld [vmem:[%s3209_s4 + $0x180] sm:$0xff] }
  0x3a   :  { %1407 = vmatpush1.bf16.msra.mxu0 %v1406_v40  ;;  %v487_v40 = vld [vmem:[%s3209_s4 + $0xb0] sm:$0xff]  ;;  %v517_v17 = vld [vmem:[%s3209_s4 + $0x1a0] sm:$0xff]  ;;  %v526_v19 = vld [vmem:[%s3209_s4 + $0x1e8] sm:$0xff] }
  0x3b   :  { %1409 = vmatprep.subr.bf16.mxu0 %v1408_v45  ;;  %v493_v45 = vld [vmem:[%s3209_s4 + $0xe0] sm:$0xff]  ;;  %v1586_v48 = vpack.c.bf16 %v487_v40, %v483_v39  ;;  %v1474_v22 = vpack.c.bf16 %v517_v17, %v513_v16  ;;  %v515_v23 = vld [vmem:[%s3209_s4 + $0x190] sm:$0xff]  ;;  %v528_v27 = vld [vmem:[%s3209_s4 + $0x1f8] sm:$0xff] }
  0x3c   :  { %1439 = vmatpush1.bf16.msra.mxu1 %v1438_v51  ;;  %v1462_v50 = vpack.c.bf16 %v493_v45, %v489_v44  ;;  %v491_v51 = vld [vmem:[%s3209_s4 + $0xd0] sm:$0xff]  ;;  %v521_v28 = vld [vmem:[%s3209_s4 + $0x1c0] sm:$0xff]  ;;  %v534_v31 = vld [vmem:[%s3209_s4 + $0x228] sm:$0xff] }
  0x3d   :  { %1441 = vmatprep.subr.bf16.mxu1 %v1440_v54  ;;  %v1464_v54 = vpack.c.bf16 %v502_v47, %v498_v46  ;;  %v525_v29 = vld [vmem:[%s3209_s4 + $0x1e0] sm:$0xff]  ;;  %v523_v35 = vld [vmem:[%s3209_s4 + $0x1d0] sm:$0xff]  ;;  %v536_v39 = vld [vmem:[%s3209_s4 + $0x238] sm:$0xff] }
  0x3e   :  { %1411 = vmatpush1.bf16.msra.mxu0 %v1410_v52  ;;  %v495_v52 = vld [vmem:[%s3209_s4 + $0xf0] sm:$0xff]  ;;  %v1478_v34 = vpack.c.bf16 %v525_v29, %v521_v28  ;;  %v529_v40 = vld [vmem:[%s3209_s4 + $0x200] sm:$0xff] }
  0x3f   :  { %1413 = vmatprep.subr.bf16.mxu0 %v1412_v57  ;;  %v501_v57 = vld [vmem:[%s3209_s4 + $0x120] sm:$0xff]  ;;  %v1590_v60 = vpack.c.bf16 %v495_v52, %v491_v51  ;;  %v531_v45 = vld [vmem:[%s3209_s4 + $0x210] sm:$0xff]  ;;  %v544_v52 = vld [vmem:[%s3209_s4 + $0x278] sm:$0xff] }
  0x40   :  { %1443 = vmatpush1.bf16.msra.mxu1 %v1442_v63  ;;  %v1466_v62 = vpack.c.bf16 %v501_v57, %v497_v56  ;;  %v499_v63 = vld [vmem:[%s3209_s4 + $0x110] sm:$0xff]  ;;  %v533_v41 = vld [vmem:[%s3209_s4 + $0x220] sm:$0xff] }
  0x41   :  { %1445 = vmatprep.subr.bf16.mxu1 %v1444_v1  ;;  %v508_v1 = vld [vmem:[%s3209_s4 + $0x158] sm:$0xff]  ;;  %v1482_v44 = vpack.c.bf16 %v533_v41, %v529_v40  ;;  %v535_v46 = vld [vmem:[%s3209_s4 + $0x230] sm:$0xff]  ;;  %v537_v53 = vld [vmem:[%s3209_s4 + $0x240] sm:$0xff] }
  0x42   :  { %1415 = vmatpush1.bf16.msra.mxu0 %v1414_v0  ;;  %v503_v0 = vld [vmem:[%s3209_s4 + $0x130] sm:$0xff]  ;;  %v1596_v10 = vpack.c.bf16 %v512_v4, %v508_v1  ;;  %v1610_v47 = vpack.c.bf16 %v535_v46, %v531_v45  ;;  %v545_v1 = vld [vmem:[%s3209_s4 + $0x280] sm:$0xff]  ;;  %v582_v45 = vld [vmem:[%s3209_s4 + $0x3a8] sm:$0xff] }
  0x43   :  { %1449 = vmatprep.subr.bf16.mxu0 %v1448_v6  ;;  %v509_v6 = vld [vmem:[%s3209_s4 + $0x160] sm:$0xff]  ;;  %v1594_v9 = vpack.c.bf16 %v503_v0, %v499_v63  ;;  %v539_v57 = vld [vmem:[%s3209_s4 + $0x250] sm:$0xff]  ;;  %v552_v0 = vld [vmem:[%s3209_s4 + $0x2b8] sm:$0xff] }
  0x44   :  { %1447 = vmatpush1.bf16.msra.mxu1 %v1446_v12  ;;  %v1470_v3 = vpack.c.bf16 %v509_v6, %v505_v5  ;;  %v511_v12 = vld [vmem:[%s3209_s4 + $0x170] sm:$0xff]  ;;  %v580_v46 = vld [vmem:[%s3209_s4 + $0x398] sm:$0xff] }
  0x45   :  { %360 = vmatmul.mubr.f32.vlgmr.msra.gmra.mrb[0].mxu0 %v23_v11  ;;  %1577 = vmatprep.subr.bf16.mxu1 %v1576_v13  ;;  %v516_v13 = vld [vmem:[%s3209_s4 + $0x198] sm:$0xff]  ;;  %v543_v58 = vld [vmem:[%s3209_s4 + $0x270] sm:$0xff] }
  0x46   :  { %1451 = vmatpush1.bf16.msra.mxu0 %v1450_v14  ;;  %v1472_v14 = vpack.c.bf16 %v518_v8, %v514_v7  ;;  %v1600_v21 = vpack.c.bf16 %v520_v15, %v516_v13  ;;  %v1614_v59 = vpack.c.bf16 %v543_v58, %v539_v57  ;;  %v547_v6 = vld [vmem:[%s3209_s4 + $0x290] sm:$0xff]  ;;  %v553_v13 = vld [vmem:[%s3209_s4 + $0x2c0] sm:$0xff]  ;;  %v590_v57 = vld [vmem:[%s3209_s4 + $0x3e8] sm:$0xff] }
  0x47   :  { %1453 = vmatprep.subr.bf16.mxu0 %v1452_v18  ;;  %431 = vmatmul.mubr.f32.vlgmr.msra.gmra.mrb[0].mxu1 %v23_v11  ;;  %v507_v11 = vld [vmem:[%s3209_s4 + $0x150] sm:$0xff]  ;;  %v522_v18 = vld [vmem:[%s3209_s4 + $0x1c8] sm:$0xff]  ;;  %v588_v58 = vld [vmem:[%s3209_s4 + $0x3d8] sm:$0xff] }
  0x48   :  { %1579 = vmatpush1.bf16.msra.mxu1 %v1578_v24  ;;  %v1598_v20 = vpack.c.bf16 %v511_v12, %v507_v11  ;;  %v519_v24 = vld [vmem:[%s3209_s4 + $0x1b0] sm:$0xff]  ;;  %v560_v12 = vld [vmem:[%s3209_s4 + $0x2f8] sm:$0xff] }
  0x49   :  { %1581 = vmatprep.subr.bf16.mxu1 %v1580_v25  ;;  %v524_v25 = vld [vmem:[%s3209_s4 + $0x1d8] sm:$0xff]  ;;  %v1602_v32 = vpack.c.bf16 %v519_v24, %v515_v23  ;;  %v551_v7 = vld [vmem:[%s3209_s4 + $0x2b0] sm:$0xff] }
  0x4a   :  { %1455 = vmatpush1.bf16.msra.mxu0 %v1454_v26  ;;  %v1476_v26 = vpack.c.bf16 %v526_v19, %v522_v18  ;;  %v1604_v33 = vpack.c.bf16 %v528_v27, %v524_v25  ;;  %v1618_v8 = vpack.c.bf16 %v551_v7, %v547_v6  ;;  %v555_v17 = vld [vmem:[%s3209_s4 + $0x2d0] sm:$0xff]  ;;  %v568_v24 = vld [vmem:[%s3209_s4 + $0x338] sm:$0xff]  ;;  %v561_v25 = vld [vmem:[%s3209_s4 + $0x300] sm:$0xff] }
  0x4b   :  { %1457 = vmatprep.subr.bf16.mxu0 %v1456_v30  ;;  %v530_v30 = vld [vmem:[%s3209_s4 + $0x208] sm:$0xff]  ;;  %v559_v18 = vld [vmem:[%s3209_s4 + $0x2f0] sm:$0xff]  ;;  %v596_v7 = vld [vmem:[%s3209_s4 + $0x418] sm:$0xff] }
  0x4c   :  { %1583 = vmatpush1.bf16.msra.mxu1 %v1582_v36  ;;  %v527_v36 = vld [vmem:[%s3209_s4 + $0x1f0] sm:$0xff]  ;;  %v1622_v19 = vpack.c.bf16 %v559_v18, %v555_v17  ;;  %v598_v6 = vld [vmem:[%s3209_s4 + $0x428] sm:$0xff] }
  0x4d   :  { %1585 = vmatprep.subr.bf16.mxu1 %v1584_v37  ;;  %v532_v37 = vld [vmem:[%s3209_s4 + $0x218] sm:$0xff]  ;;  %v563_v29 = vld [vmem:[%s3209_s4 + $0x310] sm:$0xff] }
  0x4e   :  { %1459 = vmatpush1.bf16.msra.mxu0 %v1458_v38  ;;  %v1480_v38 = vpack.c.bf16 %v534_v31, %v530_v30  ;;  %v1608_v43 = vpack.c.bf16 %v536_v39, %v532_v37  ;;  %v567_v30 = vld [vmem:[%s3209_s4 + $0x330] sm:$0xff]  ;;  %v569_v37 = vld [vmem:[%s3209_s4 + $0x340] sm:$0xff] }
  0x4f   :  { %1461 = vmatprep.subr.bf16.mxu0 %v1460_v42  ;;  %v1606_v42 = vpack.c.bf16 %v527_v36, %v523_v35  ;;  %v1626_v31 = vpack.c.bf16 %v567_v30, %v563_v29  ;;  %v576_v36 = vld [vmem:[%s3209_s4 + $0x378] sm:$0xff]  ;;  %v571_v41 = vld [vmem:[%s3209_s4 + $0x350] sm:$0xff]  ;;  %v606_v29 = vld [vmem:[%s3209_s4 + $0x468] sm:$0xff] }
  0x50   :  { %1587 = vmatpush1.bf16.msra.mxu1 %v1586_v48  ;;  %v538_v48 = vld [vmem:[%s3209_s4 + $0x248] sm:$0xff]  ;;  %v604_v30 = vld [vmem:[%s3209_s4 + $0x458] sm:$0xff] }
  0x51   :  { %1589 = vmatprep.subr.bf16.mxu1 %v1588_v49  ;;  %v542_v49 = vld [vmem:[%s3209_s4 + $0x268] sm:$0xff] }
  0x52   :  { %1463 = vmatpush1.bf16.msra.mxu0 %v1462_v50  ;;  %v540_v50 = vld [vmem:[%s3209_s4 + $0x258] sm:$0xff]  ;;  %v1484_v51 = vpack.c.bf16 %v542_v49, %v538_v48  ;;  %v577_v49 = vld [vmem:[%s3209_s4 + $0x380] sm:$0xff] }
  0x53   :  { %1465 = vmatprep.subr.bf16.mxu0 %v1464_v54  ;;  %v541_v54 = vld [vmem:[%s3209_s4 + $0x260] sm:$0xff]  ;;  %v1612_v55 = vpack.c.bf16 %v544_v52, %v540_v50  ;;  %v584_v48 = vld [vmem:[%s3209_s4 + $0x3b8] sm:$0xff] }
  0x54   :  { %1591 = vmatpush1.bf16.msra.mxu1 %v1590_v60  ;;  %v1486_v56 = vpack.c.bf16 %v541_v54, %v537_v53  ;;  %v546_v60 = vld [vmem:[%s3209_s4 + $0x288] sm:$0xff]  ;;  %v581_v50 = vld [vmem:[%s3209_s4 + $0x3a0] sm:$0xff]  ;;  %v579_v53 = vld [vmem:[%s3209_s4 + $0x390] sm:$0xff] }
  0x55   :  { %1593 = vmatprep.subr.bf16.mxu1 %v1592_v61  ;;  %v550_v61 = vld [vmem:[%s3209_s4 + $0x2a8] sm:$0xff]  ;;  %v1506_v52 = vpack.c.bf16 %v581_v50, %v577_v49  ;;  %v583_v54 = vld [vmem:[%s3209_s4 + $0x3b0] sm:$0xff] }
  0x56   :  { %1467 = vmatpush1.bf16.msra.mxu0 %v1466_v62  ;;  %v548_v62 = vld [vmem:[%s3209_s4 + $0x298] sm:$0xff]  ;;  %v1488_v63 = vpack.c.bf16 %v550_v61, %v546_v60  ;;  %v585_v61 = vld [vmem:[%s3209_s4 + $0x3c0] sm:$0xff] }
  0x57   :  { %1469 = vmatprep.subr.bf16.mxu0 %v1468_v2  ;;  %v549_v2 = vld [vmem:[%s3209_s4 + $0x2a0] sm:$0xff]  ;;  %v1616_v4 = vpack.c.bf16 %v552_v0, %v548_v62  ;;  %v592_v60 = vld [vmem:[%s3209_s4 + $0x3f8] sm:$0xff] }
  0x58   :  { %1595 = vmatpush1.bf16.msra.mxu1 %v1594_v9  ;;  %v1490_v5 = vpack.c.bf16 %v549_v2, %v545_v1  ;;  %v554_v9 = vld [vmem:[%s3209_s4 + $0x2c8] sm:$0xff]  ;;  %v589_v62 = vld [vmem:[%s3209_s4 + $0x3e0] sm:$0xff]  ;;  %v587_v1 = vld [vmem:[%s3209_s4 + $0x3d0] sm:$0xff] }
  0x59   :  { %1597 = vmatprep.subr.bf16.mxu1 %v1596_v10  ;;  %v558_v10 = vld [vmem:[%s3209_s4 + $0x2e8] sm:$0xff]  ;;  %v1510_v0 = vpack.c.bf16 %v589_v62, %v585_v61  ;;  %v591_v2 = vld [vmem:[%s3209_s4 + $0x3f0] sm:$0xff] }
  0x5a   :  { %1471 = vmatpush1.bf16.msra.mxu0 %v1470_v3  ;;  %v556_v3 = vld [vmem:[%s3209_s4 + $0x2d8] sm:$0xff]  ;;  %v1492_v11 = vpack.c.bf16 %v558_v10, %v554_v9 }
  0x5b   :  { %1473 = vmatprep.subr.bf16.mxu0 %v1472_v14  ;;  %v557_v14 = vld [vmem:[%s3209_s4 + $0x2e0] sm:$0xff]  ;;  %v1620_v15 = vpack.c.bf16 %v560_v12, %v556_v3  ;;  %v600_v9 = vld [vmem:[%s3209_s4 + $0x438] sm:$0xff] }
  0x5c   :  { %1599 = vmatpush1.bf16.msra.mxu1 %v1598_v20  ;;  %v1494_v16 = vpack.c.bf16 %v557_v14, %v553_v13  ;;  %v562_v20 = vld [vmem:[%s3209_s4 + $0x308] sm:$0xff]  ;;  %v1640_v10 = vpack.c.bf16 %v600_v9, %v596_v7  ;;  %v632_v9 = vld [vmem:[%s3209_s4 + $0x538] sm:$0xff] }
  0x5d   :  { %1601 = vmatprep.subr.bf16.mxu1 %v1600_v21  ;;  %v566_v21 = vld [vmem:[%s3209_s4 + $0x328] sm:$0xff] }
  0x5e   :  { %1475 = vmatpush1.bf16.msra.mxu0 %v1474_v22  ;;  %v564_v22 = vld [vmem:[%s3209_s4 + $0x318] sm:$0xff]  ;;  %v1496_v23 = vpack.c.bf16 %v566_v21, %v562_v20  ;;  %v630_v7 = vld [vmem:[%s3209_s4 + $0x528] sm:$0xff] }
  0x5f   :  { %1477 = vmatprep.subr.bf16.mxu0 %v1476_v26  ;;  %v565_v26 = vld [vmem:[%s3209_s4 + $0x320] sm:$0xff]  ;;  %v1624_v27 = vpack.c.bf16 %v568_v24, %v564_v22 }
  0x60   :  { %1603 = vmatpush1.bf16.msra.mxu1 %v1602_v32  ;;  %v1498_v28 = vpack.c.bf16 %v565_v26, %v561_v25  ;;  %v570_v32 = vld [vmem:[%s3209_s4 + $0x348] sm:$0xff]  ;;  %v597_v24 = vld [vmem:[%s3209_s4 + $0x420] sm:$0xff]  ;;  %v595_v25 = vld [vmem:[%s3209_s4 + $0x410] sm:$0xff] }
  0x61   :  { %1605 = vmatprep.subr.bf16.mxu1 %v1604_v33  ;;  %v574_v33 = vld [vmem:[%s3209_s4 + $0x368] sm:$0xff]  ;;  %v599_v26 = vld [vmem:[%s3209_s4 + $0x430] sm:$0xff] }
  0x62   :  { %1479 = vmatpush1.bf16.msra.mxu0 %v1478_v34  ;;  %v572_v34 = vld [vmem:[%s3209_s4 + $0x358] sm:$0xff]  ;;  %v1500_v35 = vpack.c.bf16 %v574_v33, %v570_v32 }
  0x63   :  { %1481 = vmatprep.subr.bf16.mxu0 %v1480_v38  ;;  %v573_v38 = vld [vmem:[%s3209_s4 + $0x360] sm:$0xff]  ;;  %v1628_v39 = vpack.c.bf16 %v576_v36, %v572_v34 }
  0x64   :  { %1607 = vmatpush1.bf16.msra.mxu1 %v1606_v42  ;;  %v1502_v40 = vpack.c.bf16 %v573_v38, %v569_v37  ;;  %v575_v42 = vld [vmem:[%s3209_s4 + $0x370] sm:$0xff]  ;;  %v601_v36 = vld [vmem:[%s3209_s4 + $0x440] sm:$0xff] }
  0x65   :  { %1609 = vmatprep.subr.bf16.mxu1 %v1608_v43  ;;  %v1630_v43 = vpack.c.bf16 %v575_v42, %v571_v41  ;;  %v605_v37 = vld [vmem:[%s3209_s4 + $0x460] sm:$0xff]  ;;  %v603_v41 = vld [vmem:[%s3209_s4 + $0x450] sm:$0xff] }
  0x66   :  { %1483 = vmatpush1.bf16.msra.mxu0 %v1482_v44  ;;  %v578_v44 = vld [vmem:[%s3209_s4 + $0x388] sm:$0xff]  ;;  %v607_v42 = vld [vmem:[%s3209_s4 + $0x470] sm:$0xff]  ;;  %v1518_v49 = vpack.c.bf16 %v605_v37, %v601_v36  ;;  %v641_v36 = vld [vmem:[%s3209_s4 + $0x580] sm:$0xff] }
  0x67   :  { %1485 = vmatprep.subr.bf16.mxu0 %v1484_v51  ;;  %v1632_v51 = vpack.c.bf16 %v584_v48, %v580_v46  ;;  %v612_v46 = vld [vmem:[%s3209_s4 + $0x498] sm:$0xff]  ;;  %v1646_v50 = vpack.c.bf16 %v607_v42, %v603_v41  ;;  %v645_v37 = vld [vmem:[%s3209_s4 + $0x5a0] sm:$0xff]  ;;  %v647_v41 = vld [vmem:[%s3209_s4 + $0x5b0] sm:$0xff] }
  0x68   :  { %1611 = vmatpush1.bf16.msra.mxu1 %v1610_v47  ;;  %v1504_v47 = vpack.c.bf16 %v582_v45, %v578_v44  ;;  %v614_v45 = vld [vmem:[%s3209_s4 + $0x4a8] sm:$0xff] }
  0x69   :  { %1613 = vmatprep.subr.bf16.mxu1 %v1612_v55  ;;  %v1634_v55 = vpack.c.bf16 %v583_v54, %v579_v53  ;;  %v650_v42 = vld [vmem:[%s3209_s4 + $0x5c8] sm:$0xff] }
  0x6a   :  { %1487 = vmatpush1.bf16.msra.mxu0 %v1486_v56  ;;  %v586_v56 = vld [vmem:[%s3209_s4 + $0x3c8] sm:$0xff] }
  0x6b   :  { %1489 = vmatprep.subr.bf16.mxu0 %v1488_v63  ;;  %v1636_v63 = vpack.c.bf16 %v592_v60, %v588_v58  ;;  %v622_v58 = vld [vmem:[%s3209_s4 + $0x4e8] sm:$0xff]  ;;  %v624_v60 = vld [vmem:[%s3209_s4 + $0x4f8] sm:$0xff] }
  0x6c   :  { %1615 = vmatpush1.bf16.msra.mxu1 %v1614_v59  ;;  %v1508_v59 = vpack.c.bf16 %v590_v57, %v586_v56  ;;  %v615_v56 = vld [vmem:[%s3209_s4 + $0x4b0] sm:$0xff]  ;;  %v618_v57 = vld [vmem:[%s3209_s4 + $0x4c8] sm:$0xff] }
  0x6d   :  { %1617 = vmatprep.subr.bf16.mxu1 %v1616_v4  ;;  %v1638_v4 = vpack.c.bf16 %v591_v2, %v587_v1  ;;  %v1524_v1 = vpack.c.bf16 %v622_v58, %v618_v57  ;;  %v664_v57 = vld [vmem:[%s3209_s4 + $0x638] sm:$0xff] }
  0x6e   :  { %1491 = vmatpush1.bf16.msra.mxu0 %v1490_v5  ;;  %v594_v5 = vld [vmem:[%s3209_s4 + $0x408] sm:$0xff] }
  0x6f   :  { %1493 = vmatprep.subr.bf16.mxu0 %v1492_v11 }
  0x70   :  { %1619 = vmatpush1.bf16.msra.mxu1 %v1618_v8  ;;  %v1512_v8 = vpack.c.bf16 %v598_v6, %v594_v5  ;;  %v623_v5 = vld [vmem:[%s3209_s4 + $0x4f0] sm:$0xff]  ;;  %v626_v6 = vld [vmem:[%s3209_s4 + $0x508] sm:$0xff] }
  0x71   :  { %1621 = vmatprep.subr.bf16.mxu1 %v1620_v15 }
  0x72   :  { %1495 = vmatpush1.bf16.msra.mxu0 %v1494_v16 }
  0x73   :  { %1497 = vmatprep.subr.bf16.mxu0 %v1496_v23  ;;  %v593_v23 = vld [vmem:[%s3209_s4 + $0x400] sm:$0xff] }
  0x74   :  { %1623 = vmatpush1.bf16.msra.mxu1 %v1622_v19  ;;  %v1514_v34 = vpack.c.bf16 %v597_v24, %v593_v23  ;;  %v633_v24 = vld [vmem:[%s3209_s4 + $0x540] sm:$0xff] }
  0x75   :  { %1625 = vmatprep.subr.bf16.mxu1 %v1624_v27  ;;  %v602_v27 = vld [vmem:[%s3209_s4 + $0x448] sm:$0xff] }
  0x76   :  { %1499 = vmatpush1.bf16.msra.mxu0 %v1498_v28 }
  0x77   :  { %1501 = vmatprep.subr.bf16.mxu0 %v1500_v35  ;;  %v1642_v35 = vpack.c.bf16 %v599_v26, %v595_v25  ;;  %v637_v25 = vld [vmem:[%s3209_s4 + $0x560] sm:$0xff] }
  0x78   :  { %1627 = vmatpush1.bf16.msra.mxu1 %v1626_v31  ;;  %v608_v31 = vld [vmem:[%s3209_s4 + $0x478] sm:$0xff] }
  0x79   :  { %1629 = vmatprep.subr.bf16.mxu1 %v1628_v39  ;;  %v1516_v39 = vpack.c.bf16 %v606_v29, %v602_v27  ;;  %v639_v29 = vld [vmem:[%s3209_s4 + $0x570] sm:$0xff] }
  0x7a   :  { %1503 = vmatpush1.bf16.msra.mxu0 %v1502_v40  ;;  %v1644_v40 = vpack.c.bf16 %v608_v31, %v604_v30  ;;  %v642_v30 = vld [vmem:[%s3209_s4 + $0x588] sm:$0xff] }
  0x7b   :  { %1505 = vmatprep.subr.bf16.mxu0 %v1504_v47  ;;  %v616_v47 = vld [vmem:[%s3209_s4 + $0x4b8] sm:$0xff]  ;;  %v646_v31 = vld [vmem:[%s3209_s4 + $0x5a8] sm:$0xff] }
  0x7c   :  { %1631 = vmatpush1.bf16.msra.mxu1 %v1630_v43  ;;  %v610_v43 = vld [vmem:[%s3209_s4 + $0x488] sm:$0xff]  ;;  %v1648_v54 = vpack.c.bf16 %v616_v47, %v612_v46  ;;  %v1538_v46 = vpack.c.bf16 %v645_v37, %v641_v36 }
  0x7d   :  { %1633 = vmatprep.subr.bf16.mxu1 %v1632_v51  ;;  %v609_v51 = vld [vmem:[%s3209_s4 + $0x480] sm:$0xff]  ;;  %v1520_v53 = vpack.c.bf16 %v614_v45, %v610_v43  ;;  %v654_v43 = vld [vmem:[%s3209_s4 + $0x5e8] sm:$0xff]  ;;  %v656_v45 = vld [vmem:[%s3209_s4 + $0x5f8] sm:$0xff] }
  0x7e   :  { %1507 = vmatpush1.bf16.msra.mxu0 %v1506_v52  ;;  %v613_v52 = vld [vmem:[%s3209_s4 + $0x4a0] sm:$0xff] }
  0x7f   :  { %1509 = vmatprep.subr.bf16.mxu0 %v1508_v59  ;;  %v620_v59 = vld [vmem:[%s3209_s4 + $0x4d8] sm:$0xff]  ;;  %v1522_v61 = vpack.c.bf16 %v613_v52, %v609_v51  ;;  %v651_v52 = vld [vmem:[%s3209_s4 + $0x5d0] sm:$0xff] }
  0x80   :  { %1635 = vmatpush1.bf16.msra.mxu1 %v1634_v55  ;;  %v611_v55 = vld [vmem:[%s3209_s4 + $0x490] sm:$0xff]  ;;  %v1652_v2 = vpack.c.bf16 %v624_v60, %v620_v59  ;;  %v657_v60 = vld [vmem:[%s3209_s4 + $0x600] sm:$0xff] }
  0x81   :  { %1637 = vmatprep.subr.bf16.mxu1 %v1636_v63  ;;  %v1650_v62 = vpack.c.bf16 %v615_v56, %v611_v55  ;;  %v617_v63 = vld [vmem:[%s3209_s4 + $0x4c0] sm:$0xff]  ;;  %v662_v55 = vld [vmem:[%s3209_s4 + $0x628] sm:$0xff]  ;;  %v660_v56 = vld [vmem:[%s3209_s4 + $0x618] sm:$0xff] }
  0x82   :  { %1511 = vmatpush1.bf16.msra.mxu0 %v1510_v0  ;;  %v621_v0 = vld [vmem:[%s3209_s4 + $0x4e0] sm:$0xff] }
  0x83   :  { %1513 = vmatprep.subr.bf16.mxu0 %v1512_v8  ;;  %v628_v8 = vld [vmem:[%s3209_s4 + $0x518] sm:$0xff] }
  0x84   :  { %1639 = vmatpush1.bf16.msra.mxu1 %v1638_v4  ;;  %v619_v4 = vld [vmem:[%s3209_s4 + $0x4d0] sm:$0xff] }
  0x85   :  { %1641 = vmatprep.subr.bf16.mxu1 %v1640_v10  ;;  %v1526_v10 = vpack.c.bf16 %v621_v0, %v617_v63  ;;  %v1672_v63 = vpack.c.bf16 %v664_v57, %v660_v56  ;;  %v659_v0 = vld [vmem:[%s3209_s4 + $0x610] sm:$0xff]  ;;  %v704_v56 = vld [vmem:[%s3209_s4 + $0x778] sm:$0xff] }
 0x118   :  { %v361_v3 = vpop.f32.mrb[0].mxu0 }
 0x119   :  { %v1242_v11 = vmul.f32 -1.442695, %v361_v3  ;;  %v363_v12 = vpop.f32.mrb[1].mxu0 }
 0x11a   :  { %v1243_v13 = vmul.f32 -1.442695, %v363_v12  ;;  %v2635_v14 = vpop.f32.mrb[0].mxu1 }
 0x11b   :  { %1777 = vpow2.f32 %v1242_v11  ;;  %v434_v15 = vpop.f32.mrb[1].mxu1  ;;  %v625_v11 = vld [vmem:[%s3209_s4 + $0x500] sm:$0xff] }
 0x11c   :  { %1779 = vpow2.f32 %v1243_v13  ;;  %v1245_v16 = vmul.f32 -1.442695, %v434_v15  ;;  %v1528_v13 = vpack.c.bf16 %v630_v7, %v626_v6  ;;  %v672_v6 = vld [vmem:[%s3209_s4 + $0x678] sm:$0xff]  ;;  %v1244_v7 = vmul.f32 -1.442695, %v2635_v14 }
 0x11e   :  { %1781 = vpow2.f32 %v1245_v16  ;;  %v627_v16 = vld [vmem:[%s3209_s4 + $0x510] sm:$0xff] }
 0x125   :  { %v1778_v17 = vpop.eup %1777 }
 0x126   :  { %v1780_v18 = vpop.eup %1779  ;;  %v449_v19 = vadd.f32 1.0, %v1778_v17  ;;  %v631_v17 = vld [vmem:[%s3209_s4 + $0x530] sm:$0xff] }
 0x127   :  { %v450_v20 = vadd.f32 1.0, %v1780_v18  ;;  %v634_v18 = vld [vmem:[%s3209_s4 + $0x548] sm:$0xff]  ;;  %v1658_v23 = vpack.c.bf16 %v631_v17, %v627_v16 }
 0x128   :  { %1783 = vrcp.f32 %v449_v19  ;;  %v1782_v21 = vpop.eup %1781  ;;  %v638_v19 = vld [vmem:[%s3209_s4 + $0x568] sm:$0xff] }
 0x129   :  { %1785 = vrcp.f32 %v450_v20  ;;  %v452_v22 = vadd.f32 1.0, %v1782_v21  ;;  %v636_v20 = vld [vmem:[%s3209_s4 + $0x558] sm:$0xff]  ;;  %v1532_v26 = vpack.c.bf16 %v638_v19, %v634_v18  ;;  %v674_v16 = vld [vmem:[%s3209_s4 + $0x688] sm:$0xff] }
 0x12a   :  { %v640_v21 = vld [vmem:[%s3209_s4 + $0x578] sm:$0xff]  ;;  %v678_v17 = vld [vmem:[%s3209_s4 + $0x6a8] sm:$0xff] }
 0x12b   :  { %1787 = vrcp.f32 %v452_v22  ;;  %v1660_v27 = vpack.c.bf16 %v640_v21, %v636_v20  ;;  %v676_v18 = vld [vmem:[%s3209_s4 + $0x698] sm:$0xff] }
 0x12c   :  { %v680_v19 = vld [vmem:[%s3209_s4 + $0x6b8] sm:$0xff]  ;;  %1789 = vpow2.f32 %v1244_v7 }
 0x132   :  { %v1784_v28 = vpop.eup %1783 }
 0x133   :  { %v1786_v32 = vpop.eup %1785  ;;  %v461_v38 = vmul.f32 %v1784_v28, %v361_v3  ;;  %v1654_v3 = vpack.c.bf16 %v623_v5, %v619_v4  ;;  %v635_v28 = vld [vmem:[%s3209_s4 + $0x550] sm:$0xff]  ;;  %v670_v4 = vld [vmem:[%s3209_s4 + $0x668] sm:$0xff]  ;;  %v668_v5 = vld [vmem:[%s3209_s4 + $0x658] sm:$0xff] }
 0x134   :  { %v462_v33 = vmul.f32 %v1786_v32, %v363_v12  ;;  %v629_v12 = vld [vmem:[%s3209_s4 + $0x520] sm:$0xff]  ;;  %v644_v32 = vld [vmem:[%s3209_s4 + $0x598] sm:$0xff] }
 0x135   :  { %v1788_v44 = vpop.eup %1787  ;;  %v1530_v22 = vpack.c.bf16 %v629_v12, %v625_v11  ;;  %v1676_v12 = vpack.c.bf16 %v672_v6, %v668_v5  ;;  %v708_v5 = vld [vmem:[%s3209_s4 + $0x798] sm:$0xff] }
 0x136   :  { %785 = vmatprep.mubr.f32.mxu0 %v462_v33  ;;  %927 = vmatprep.mubr.f32.mxu1 %v462_v33  ;;  %v464_v48 = vmul.f32 %v1788_v44, %v434_v15  ;;  %v1656_v15 = vpack.c.bf16 %v632_v9, %v628_v8  ;;  %v648_v33 = vld [vmem:[%s3209_s4 + $0x5b8] sm:$0xff] }
 0x137   :  { %786 = vmatmul.mubr.f32.vlgmr.msra.gmra.mrb[2].mxu0 %v461_v38  ;;  %928 = vmatmul.mubr.f32.vlgmr.msra.gmra.mrb[2].mxu1 %v461_v38  ;;  %v1536_v38 = vpack.c.bf16 %v646_v31, %v642_v30  ;;  %v652_v44 = vld [vmem:[%s3209_s4 + $0x5d8] sm:$0xff] }
 0x138   :  { %1515 = vmatpush1.bf16.msra.mxu0 %v1514_v34  ;;  %1643 = vmatpush1.bf16.msra.mxu1 %v1642_v35  ;;  %v1534_v34 = vpack.c.bf16 %v637_v25, %v633_v24  ;;  %v1662_v35 = vpack.c.bf16 %v639_v29, %v635_v28  ;;  %v1668_v51 = vpack.c.bf16 %v656_v45, %v652_v44  ;;  %v682_v28 = vld [vmem:[%s3209_s4 + $0x6c8] sm:$0xff]  ;;  %v684_v30 = vld [vmem:[%s3209_s4 + $0x6d8] sm:$0xff] }
 0x139   :  { %1517 = vmatprep.subr.bf16.mxu0 %v1516_v39  ;;  %1645 = vmatprep.subr.bf16.mxu1 %v1644_v40  ;;  %v1664_v39 = vpack.c.bf16 %v648_v33, %v644_v32  ;;  %v643_v40 = vld [vmem:[%s3209_s4 + $0x590] sm:$0xff]  ;;  %v1552_v24 = vpack.c.bf16 %v678_v17, %v674_v16  ;;  %v1680_v25 = vpack.c.bf16 %v680_v19, %v676_v18  ;;  %v686_v29 = vld [vmem:[%s3209_s4 + $0x6e8] sm:$0xff]  ;;  %v688_v31 = vld [vmem:[%s3209_s4 + $0x6f8] sm:$0xff] }
 0x13a   :  { %856 = vmatprep.mubr.f32.mxu0 %v464_v48  ;;  %998 = vmatprep.mubr.f32.mxu1 %v464_v48  ;;  %v1666_v47 = vpack.c.bf16 %v647_v41, %v643_v40  ;;  %v649_v48 = vld [vmem:[%s3209_s4 + $0x5c0] sm:$0xff]  ;;  %v1556_v36 = vpack.c.bf16 %v686_v29, %v682_v28  ;;  %v1684_v37 = vpack.c.bf16 %v688_v31, %v684_v30  ;;  %v690_v40 = vld [vmem:[%s3209_s4 + $0x708] sm:$0xff]  ;;  %v712_v6 = vld [vmem:[%s3209_s4 + $0x7b8] sm:$0xff] }
 0x13b   :  { %v694_v41 = vld [vmem:[%s3209_s4 + $0x728] sm:$0xff]  ;;  %v716_v17 = vld [vmem:[%s3209_s4 + $0x7d8] sm:$0xff]  ;;  %v1081_v29 = vld [vmem:[%s3211_s5 + $0x180] sm:$0xff] }
 0x13c   :  { %1519 = vmatpush1.bf16.msra.mxu0 %v1518_v49  ;;  %1647 = vmatpush1.bf16.msra.mxu1 %v1646_v50  ;;  %v653_v49 = vld [vmem:[%s3209_s4 + $0x5e0] sm:$0xff]  ;;  %v1540_v50 = vpack.c.bf16 %v654_v43, %v650_v42  ;;  %v692_v42 = vld [vmem:[%s3209_s4 + $0x718] sm:$0xff]  ;;  %v718_v16 = vld [vmem:[%s3209_s4 + $0x7e8] sm:$0xff] }
 0x13d   :  { %1521 = vmatprep.subr.bf16.mxu0 %v1520_v53  ;;  %1649 = vmatprep.subr.bf16.mxu1 %v1648_v54  ;;  %v655_v53 = vld [vmem:[%s3209_s4 + $0x5f0] sm:$0xff]  ;;  %v658_v54 = vld [vmem:[%s3209_s4 + $0x608] sm:$0xff]  ;;  %v1542_v58 = vpack.c.bf16 %v653_v49, %v649_v48  ;;  %v696_v43 = vld [vmem:[%s3209_s4 + $0x738] sm:$0xff]  ;;  %v1790_v48 = vpop.eup %1789  ;;  %v1560_v49 = vpack.c.bf16 %v694_v41, %v690_v40 }
 0x13e   :  { %v1670_v59 = vpack.c.bf16 %v655_v53, %v651_v52  ;;  %v695_v52 = vld [vmem:[%s3209_s4 + $0x730] sm:$0xff]  ;;  %v698_v53 = vld [vmem:[%s3209_s4 + $0x748] sm:$0xff]  ;;  %v451_v57 = vadd.f32 1.0, %v1790_v48  ;;  %v720_v18 = vld [vmem:[%s3209_s4 + $0x7f8] sm:$0xff] }
 0x13f   :  { %v1050_v28 = vld [vmem:[%s3211_s5 + $0x88] sm:$0xff]  ;;  %v1036_v48 = vld [vmem:[%s3211_s5 + $0x18] sm:$0xff] }
 0x140   :  { %1523 = vmatpush1.bf16.msra.mxu0 %v1522_v61  ;;  %1651 = vmatpush1.bf16.msra.mxu1 %v1650_v62  ;;  %v661_v61 = vld [vmem:[%s3209_s4 + $0x620] sm:$0xff]  ;;  %v1544_v62 = vpack.c.bf16 %v662_v55, %v658_v54  ;;  %v702_v54 = vld [vmem:[%s3209_s4 + $0x768] sm:$0xff]  ;;  %v700_v55 = vld [vmem:[%s3209_s4 + $0x758] sm:$0xff]  ;;  %1791 = vrcp.f32 %v451_v57 }
 0x141   :  { %1525 = vmatprep.subr.bf16.mxu0 %v1524_v1  ;;  %1653 = vmatprep.subr.bf16.mxu1 %v1652_v2  ;;  %v663_v1 = vld [vmem:[%s3209_s4 + $0x630] sm:$0xff]  ;;  %v666_v2 = vld [vmem:[%s3209_s4 + $0x648] sm:$0xff]  ;;  %v1546_v8 = vpack.c.bf16 %v661_v61, %v657_v60  ;;  %v697_v60 = vld [vmem:[%s3209_s4 + $0x740] sm:$0xff] }
 0x142   :  { %v1674_v9 = vpack.c.bf16 %v663_v1, %v659_v0  ;;  %v1548_v11 = vpack.c.bf16 %v670_v4, %v666_v2  ;;  %v701_v61 = vld [vmem:[%s3209_s4 + $0x760] sm:$0xff]  ;;  %v699_v0 = vld [vmem:[%s3209_s4 + $0x750] sm:$0xff]  ;;  %v706_v2 = vld [vmem:[%s3209_s4 + $0x788] sm:$0xff] }
 0x143   :  { %v703_v1 = vld [vmem:[%s3209_s4 + $0x770] sm:$0xff]  ;;  %v710_v4 = vld [vmem:[%s3209_s4 + $0x7a8] sm:$0xff]  ;;  %v1566_v7 = vpack.c.bf16 %v701_v61, %v697_v60 }
 0x144   :  { %1527 = vmatpush1.bf16.msra.mxu0 %v1526_v10  ;;  %1655 = vmatpush1.bf16.msra.mxu1 %v1654_v3  ;;  %v665_v10 = vld [vmem:[%s3209_s4 + $0x640] sm:$0xff]  ;;  %v1082_v30 = vld [vmem:[%s3211_s5 + $0x188] sm:$0xff] }
 0x145   :  { %1529 = vmatprep.subr.bf16.mxu0 %v1528_v13  ;;  %1657 = vmatprep.subr.bf16.mxu1 %v1656_v15  ;;  %v669_v3 = vld [vmem:[%s3209_s4 + $0x660] sm:$0xff]  ;;  %v667_v13 = vld [vmem:[%s3209_s4 + $0x650] sm:$0xff]  ;;  %v1038_v60 = vld [vmem:[%s3211_s5 + $0x28] sm:$0xff] }
 0x146   :  { %v671_v15 = vld [vmem:[%s3209_s4 + $0x670] sm:$0xff]  ;;  %v1550_v20 = vpack.c.bf16 %v669_v3, %v665_v10  ;;  %v709_v10 = vld [vmem:[%s3209_s4 + $0x7a0] sm:$0xff]  ;;  %v1568_v3 = vpack.c.bf16 %v710_v4, %v706_v2  ;;  %v1056_v4 = vld [vmem:[%s3211_s5 + $0xb8] sm:$0xff] }
 0x147   :  { %v1678_v21 = vpack.c.bf16 %v671_v15, %v667_v13  ;;  %v711_v13 = vld [vmem:[%s3209_s4 + $0x7b0] sm:$0xff]  ;;  %v714_v15 = vld [vmem:[%s3209_s4 + $0x7c8] sm:$0xff] }
 0x148   :  { %1531 = vmatpush1.bf16.msra.mxu0 %v1530_v22  ;;  %1659 = vmatpush1.bf16.msra.mxu1 %v1658_v23  ;;  %v673_v22 = vld [vmem:[%s3209_s4 + $0x680] sm:$0xff]  ;;  %v1055_v2 = vld [vmem:[%s3211_s5 + $0xb0] sm:$0xff] }
 0x149   :  { %1533 = vmatprep.subr.bf16.mxu0 %v1532_v26  ;;  %1661 = vmatprep.subr.bf16.mxu1 %v1660_v27  ;;  %v677_v23 = vld [vmem:[%s3209_s4 + $0x6a0] sm:$0xff]  ;;  %v675_v26 = vld [vmem:[%s3209_s4 + $0x690] sm:$0xff] }
 0x14a   :  { %v679_v27 = vld [vmem:[%s3209_s4 + $0x6b0] sm:$0xff]  ;;  %v1554_v32 = vpack.c.bf16 %v677_v23, %v673_v22  ;;  %v717_v22 = vld [vmem:[%s3209_s4 + $0x7e0] sm:$0xff]  ;;  %v1572_v23 = vpack.c.bf16 %v718_v16, %v714_v15  ;;  %v1058_v16 = vld [vmem:[%s3211_s5 + $0xc8] sm:$0xff] }
 0x14b   :  { %v1682_v33 = vpack.c.bf16 %v679_v27, %v675_v26  ;;  %v719_v26 = vld [vmem:[%s3209_s4 + $0x7f0] sm:$0xff]  ;;  %v1049_v27 = vld [vmem:[%s3211_s5 + $0x80] sm:$0xff] }
 0x14c   :  { %1535 = vmatpush1.bf16.msra.mxu0 %v1534_v34  ;;  %1663 = vmatpush1.bf16.msra.mxu1 %v1662_v35  ;;  %v681_v34 = vld [vmem:[%s3209_s4 + $0x6c0] sm:$0xff] }
 0x14d   :  { %1537 = vmatprep.subr.bf16.mxu0 %v1536_v38  ;;  %1665 = vmatprep.subr.bf16.mxu1 %v1664_v39  ;;  %v685_v35 = vld [vmem:[%s3209_s4 + $0x6e0] sm:$0xff]  ;;  %v683_v38 = vld [vmem:[%s3209_s4 + $0x6d0] sm:$0xff] }
 0x14e   :  { %v687_v39 = vld [vmem:[%s3209_s4 + $0x6f0] sm:$0xff]  ;;  %v1558_v44 = vpack.c.bf16 %v685_v35, %v681_v34  ;;  %v1736_v34 = vpack.c.bf16 %v1082_v30, %v1081_v29  ;;  %v1792_v35 = vpop.eup %1791  ;;  %v1057_v15 = vld [vmem:[%s3211_s5 + $0xc0] sm:$0xff] }
 0x14f   :  { %v1686_v45 = vpack.c.bf16 %v687_v39, %v683_v38  ;;  %v1034_v38 = vld [vmem:[%s3211_s5 + $0x8] sm:$0xff]  ;;  %v1065_v39 = vld [vmem:[%s3211_s5 + $0x100] sm:$0xff]  ;;  %v1091_v29 = vld [vmem:[%s3211_s5 + $0x1d0] sm:$0xff] }
 0x150   :  { %1539 = vmatpush1.bf16.msra.mxu0 %v1538_v46  ;;  %1667 = vmatpush1.bf16.msra.mxu1 %v1666_v47  ;;  %v689_v46 = vld [vmem:[%s3209_s4 + $0x700] sm:$0xff] }
 0x151   :  { %1541 = vmatprep.subr.bf16.mxu0 %v1540_v50  ;;  %1669 = vmatprep.subr.bf16.mxu1 %v1668_v51  ;;  %v693_v47 = vld [vmem:[%s3209_s4 + $0x720] sm:$0xff]  ;;  %v1688_v50 = vpack.c.bf16 %v696_v43, %v692_v42  ;;  %v691_v51 = vld [vmem:[%s3209_s4 + $0x710] sm:$0xff]  ;;  %v1052_v43 = vld [vmem:[%s3211_s5 + $0x98] sm:$0xff] }
 0x152   :  { %v1051_v42 = vld [vmem:[%s3211_s5 + $0x90] sm:$0xff] }
 0x154   :  { %1543 = vmatpush1.bf16.msra.mxu0 %v1542_v58  ;;  %1671 = vmatpush1.bf16.msra.mxu1 %v1670_v59  ;;  %v1562_v58 = vpack.c.bf16 %v693_v47, %v689_v46  ;;  %v1690_v59 = vpack.c.bf16 %v695_v52, %v691_v51  ;;  %v1084_v46 = vld [vmem:[%s3211_s5 + $0x198] sm:$0xff]  ;;  %v1035_v47 = vld [vmem:[%s3211_s5 + $0x10] sm:$0xff] }
 0x155   :  { %1545 = vmatprep.subr.bf16.mxu0 %v1544_v62  ;;  %1673 = vmatprep.subr.bf16.mxu1 %v1672_v63  ;;  %v1564_v62 = vpack.c.bf16 %v702_v54, %v698_v53  ;;  %v1692_v63 = vpack.c.bf16 %v704_v56, %v700_v55  ;;  %v1067_v51 = vld [vmem:[%s3211_s5 + $0x110] sm:$0xff]  ;;  %v1068_v52 = vld [vmem:[%s3211_s5 + $0x118] sm:$0xff]  ;;  %v1053_v54 = vld [vmem:[%s3211_s5 + $0xa0] sm:$0xff] }
 0x156   :  { %v1742_v53 = vpack.c.bf16 %v1068_v52, %v1067_v51  ;;  %v1054_v55 = vld [vmem:[%s3211_s5 + $0xa8] sm:$0xff]  ;;  %v1085_v56 = vld [vmem:[%s3211_s5 + $0x1a0] sm:$0xff]  ;;  %v1064_v51 = vld [vmem:[%s3211_s5 + $0xf8] sm:$0xff] }
 0x157   :  { %v1712_v57 = vpack.c.bf16 %v1054_v55, %v1053_v54  ;;  %v1095_v52 = vld [vmem:[%s3211_s5 + $0x1f0] sm:$0xff]  ;;  %v1096_v54 = vld [vmem:[%s3211_s5 + $0x1f8] sm:$0xff] }
 0x158   :  { %1547 = vmatpush1.bf16.msra.mxu0 %v1546_v8  ;;  %1675 = vmatpush1.bf16.msra.mxu1 %v1674_v9  ;;  %v1694_v8 = vpack.c.bf16 %v703_v1, %v699_v0  ;;  %v705_v9 = vld [vmem:[%s3209_s4 + $0x780] sm:$0xff]  ;;  %v1070_v0 = vld [vmem:[%s3211_s5 + $0x128] sm:$0xff]  ;;  %v1047_v55 = vld [vmem:[%s3211_s5 + $0x70] sm:$0xff] }
 0x159   :  { %1549 = vmatprep.subr.bf16.mxu0 %v1548_v11  ;;  %1677 = vmatprep.subr.bf16.mxu1 %v1676_v12  ;;  %v1696_v11 = vpack.c.bf16 %v712_v6, %v708_v5  ;;  %v707_v12 = vld [vmem:[%s3209_s4 + $0x790] sm:$0xff]  ;;  %v1570_v19 = vpack.c.bf16 %v709_v10, %v705_v9  ;;  %v1716_v6 = vpack.c.bf16 %v1056_v4, %v1055_v2  ;;  %v1040_v9 = vld [vmem:[%s3211_s5 + $0x38] sm:$0xff] }
 0x15a   :  { %v1087_v5 = vld [vmem:[%s3211_s5 + $0x1b0] sm:$0xff] }
 0x15c   :  { %1551 = vmatpush1.bf16.msra.mxu0 %v1550_v20  ;;  %1679 = vmatpush1.bf16.msra.mxu1 %v1678_v21  ;;  %v1698_v20 = vpack.c.bf16 %v711_v13, %v707_v12  ;;  %v713_v21 = vld [vmem:[%s3209_s4 + $0x7c0] sm:$0xff]  ;;  %v1072_v12 = vld [vmem:[%s3211_s5 + $0x138] sm:$0xff] }
 0x15d   :  { %1553 = vmatprep.subr.bf16.mxu0 %v1552_v24  ;;  %1681 = vmatprep.subr.bf16.mxu1 %v1680_v25  ;;  %v1700_v24 = vpack.c.bf16 %v720_v18, %v716_v17  ;;  %v715_v25 = vld [vmem:[%s3209_s4 + $0x7d0] sm:$0xff]  ;;  %v1574_v31 = vpack.c.bf16 %v717_v22, %v713_v21  ;;  %v1089_v17 = vld [vmem:[%s3211_s5 + $0x1c0] sm:$0xff]  ;;  %v1720_v18 = vpack.c.bf16 %v1058_v16, %v1057_v15  ;;  %v1042_v21 = vld [vmem:[%s3211_s5 + $0x48] sm:$0xff] }
 0x160   :  { %1555 = vmatpush1.bf16.msra.mxu0 %v1554_v32  ;;  %1683 = vmatpush1.bf16.msra.mxu1 %v1682_v33  ;;  %v1702_v32 = vpack.c.bf16 %v719_v26, %v715_v25  ;;  %v1704_v33 = vpack.c.bf16 %v1050_v28, %v1049_v27  ;;  %v1074_v25 = vld [vmem:[%s3211_s5 + $0x148] sm:$0xff]  ;;  %v1059_v27 = vld [vmem:[%s3211_s5 + $0xd0] sm:$0xff]  ;;  %v1060_v28 = vld [vmem:[%s3211_s5 + $0xd8] sm:$0xff] }
 0x161   :  { %1557 = vmatprep.subr.bf16.mxu0 %v1556_v36  ;;  %1685 = vmatprep.subr.bf16.mxu1 %v1684_v37  ;;  %v463_v36 = vmul.f32 %v1792_v35, %v2635_v14  ;;  %v1033_v37 = vld [vmem:[%s3211_s5] sm:$0xff]  ;;  %v1066_v14 = vld [vmem:[%s3211_s5 + $0x108] sm:$0xff]  ;;  %v1724_v30 = vpack.c.bf16 %v1060_v28, %v1059_v27 }
 0x162   :  { %v1706_v40 = vpack.c.bf16 %v1034_v38, %v1033_v37  ;;  %v1738_v41 = vpack.c.bf16 %v1066_v14, %v1065_v39  ;;  %v1076_v37 = vld [vmem:[%s3211_s5 + $0x158] sm:$0xff]  ;;  %v1061_v39 = vld [vmem:[%s3211_s5 + $0xe0] sm:$0xff] }
 0x163   :  { %v1093_v14 = vld [vmem:[%s3211_s5 + $0x1e0] sm:$0xff] }
 0x164   :  { %1559 = vmatpush1.bf16.msra.mxu0 %v1558_v44  ;;  %1687 = vmatpush1.bf16.msra.mxu1 %v1686_v45  ;;  %v1083_v44 = vld [vmem:[%s3211_s5 + $0x190] sm:$0xff]  ;;  %v1708_v45 = vpack.c.bf16 %v1052_v43, %v1051_v42  ;;  %v1094_v42 = vld [vmem:[%s3211_s5 + $0x1e8] sm:$0xff]  ;;  %v1045_v43 = vld [vmem:[%s3211_s5 + $0x60] sm:$0xff] }
 0x165   :  { %1561 = vmatprep.subr.bf16.mxu0 %v1560_v49  ;;  %1689 = vmatprep.subr.bf16.mxu1 %v1688_v50  ;;  %v1740_v49 = vpack.c.bf16 %v1084_v46, %v1083_v44  ;;  %v1710_v50 = vpack.c.bf16 %v1036_v48, %v1035_v47  ;;  %v1046_v44 = vld [vmem:[%s3211_s5 + $0x68] sm:$0xff]  ;;  %v1077_v47 = vld [vmem:[%s3211_s5 + $0x160] sm:$0xff] }
 0x166   :  { %v1730_v46 = vpack.c.bf16 %v1046_v44, %v1045_v43  ;;  %v1078_v48 = vld [vmem:[%s3211_s5 + $0x168] sm:$0xff] }
 0x168   :  { %1563 = vmatpush1.bf16.msra.mxu0 %v1562_v58  ;;  %1691 = vmatpush1.bf16.msra.mxu1 %v1690_v59  ;;  %v1086_v58 = vld [vmem:[%s3211_s5 + $0x1a8] sm:$0xff]  ;;  %v1037_v59 = vld [vmem:[%s3211_s5 + $0x20] sm:$0xff] }
 0x169   :  { %1565 = vmatprep.subr.bf16.mxu0 %v1564_v62  ;;  %1693 = vmatprep.subr.bf16.mxu1 %v1692_v63  ;;  %v1744_v61 = vpack.c.bf16 %v1086_v58, %v1085_v56  ;;  %v1714_v62 = vpack.c.bf16 %v1038_v60, %v1037_v59  ;;  %v1069_v63 = vld [vmem:[%s3211_s5 + $0x120] sm:$0xff]  ;;  %v1048_v56 = vld [vmem:[%s3211_s5 + $0x78] sm:$0xff]  ;;  %v1079_v59 = vld [vmem:[%s3211_s5 + $0x170] sm:$0xff] }
 0x16a   :  { %v1746_v1 = vpack.c.bf16 %v1070_v0, %v1069_v63  ;;  %v1734_v58 = vpack.c.bf16 %v1048_v56, %v1047_v55  ;;  %v1080_v60 = vld [vmem:[%s3211_s5 + $0x178] sm:$0xff] }
 0x16c   :  { %1567 = vmatpush1.bf16.msra.mxu0 %v1566_v7  ;;  %1695 = vmatpush1.bf16.msra.mxu1 %v1694_v8  ;;  %v1088_v7 = vld [vmem:[%s3211_s5 + $0x1b8] sm:$0xff]  ;;  %v1039_v8 = vld [vmem:[%s3211_s5 + $0x30] sm:$0xff] }
 0x16d   :  { %1569 = vmatprep.subr.bf16.mxu0 %v1568_v3  ;;  %1697 = vmatprep.subr.bf16.mxu1 %v1696_v11  ;;  %v1748_v10 = vpack.c.bf16 %v1088_v7, %v1087_v5  ;;  %v1718_v3 = vpack.c.bf16 %v1040_v9, %v1039_v8  ;;  %v1071_v11 = vld [vmem:[%s3211_s5 + $0x130] sm:$0xff] }
 0x16e   :  { %v1750_v13 = vpack.c.bf16 %v1072_v12, %v1071_v11 }
 0x170   :  { %1571 = vmatpush1.bf16.msra.mxu0 %v1570_v19  ;;  %1699 = vmatpush1.bf16.msra.mxu1 %v1698_v20  ;;  %v1090_v19 = vld [vmem:[%s3211_s5 + $0x1c8] sm:$0xff]  ;;  %v1041_v20 = vld [vmem:[%s3211_s5 + $0x40] sm:$0xff] }
 0x171   :  { %1573 = vmatprep.subr.bf16.mxu0 %v1572_v23  ;;  %1701 = vmatprep.subr.bf16.mxu1 %v1700_v24  ;;  %v1752_v22 = vpack.c.bf16 %v1090_v19, %v1089_v17  ;;  %v1722_v23 = vpack.c.bf16 %v1042_v21, %v1041_v20  ;;  %v1073_v24 = vld [vmem:[%s3211_s5 + $0x140] sm:$0xff] }
 0x172   :  { %v1754_v26 = vpack.c.bf16 %v1074_v25, %v1073_v24 }
 0x174   :  { %1575 = vmatpush1.bf16.msra.mxu0 %v1574_v31  ;;  %1703 = vmatpush1.bf16.msra.mxu1 %v1702_v32  ;;  %v1092_v31 = vld [vmem:[%s3211_s5 + $0x1d8] sm:$0xff]  ;;  %v1043_v32 = vld [vmem:[%s3211_s5 + $0x50] sm:$0xff] }
 0x175   :  { %1705 = vmatprep.subr.bf16.mxu0 %v1704_v33  ;;  %1737 = vmatprep.subr.bf16.mxu1 %v1736_v34  ;;  %v1044_v33 = vld [vmem:[%s3211_s5 + $0x58] sm:$0xff]  ;;  %v1756_v34 = vpack.c.bf16 %v1092_v31, %v1091_v29 }
 0x176   :  { %v1726_v35 = vpack.c.bf16 %v1044_v33, %v1043_v32 }
 0x177   :  { %857 = vmatmul.mubr.f32.vlgmr.msra.gmra.mrb[2].mxu0 %v463_v36  ;;  %999 = vmatmul.mubr.f32.vlgmr.msra.gmra.mrb[2].mxu1 %v463_v36  ;;  %v1075_v36 = vld [vmem:[%s3211_s5 + $0x150] sm:$0xff] }
 0x178   :  { %1707 = vmatpush3.bf16.msra.mxu0 %v1706_v40  ;;  %1739 = vmatpush3.bf16.msra.mxu1 %v1738_v41  ;;  %v1758_v38 = vpack.c.bf16 %v1076_v37, %v1075_v36  ;;  %v1062_v40 = vld [vmem:[%s3211_s5 + $0xe8] sm:$0xff] }
 0x179   :  { %1709 = vmatprep.subr.bf16.mxu0 %v1708_v45  ;;  %1741 = vmatprep.subr.bf16.mxu1 %v1740_v49  ;;  %v1728_v41 = vpack.c.bf16 %v1062_v40, %v1061_v39  ;;  %v1760_v45 = vpack.c.bf16 %v1094_v42, %v1093_v14  ;;  %v1762_v49 = vpack.c.bf16 %v1078_v48, %v1077_v47 }
 0x17c   :  { %1711 = vmatpush3.bf16.msra.mxu0 %v1710_v50  ;;  %1743 = vmatpush3.bf16.msra.mxu1 %v1742_v53  ;;  %v1063_v50 = vld [vmem:[%s3211_s5 + $0xf0] sm:$0xff] }
 0x17d   :  { %1713 = vmatprep.subr.bf16.mxu0 %v1712_v57  ;;  %1745 = vmatprep.subr.bf16.mxu1 %v1744_v61  ;;  %v1732_v53 = vpack.c.bf16 %v1064_v51, %v1063_v50  ;;  %v1764_v57 = vpack.c.bf16 %v1096_v54, %v1095_v52  ;;  %v1766_v61 = vpack.c.bf16 %v1080_v60, %v1079_v59 }
 0x180   :  { %1715 = vmatpush3.bf16.msra.mxu0 %v1714_v62  ;;  %1747 = vmatpush3.bf16.msra.mxu1 %v1746_v1 }
 0x181   :  { %1717 = vmatprep.subr.bf16.mxu0 %v1716_v6  ;;  %1749 = vmatprep.subr.bf16.mxu1 %v1748_v10 }
 0x184   :  { %1719 = vmatpush3.bf16.msra.mxu0 %v1718_v3  ;;  %1751 = vmatpush3.bf16.msra.mxu1 %v1750_v13 }
 0x185   :  { %1721 = vmatprep.subr.bf16.mxu0 %v1720_v18  ;;  %1753 = vmatprep.subr.bf16.mxu1 %v1752_v22 }
 0x188   :  { %1723 = vmatpush3.bf16.msra.mxu0 %v1722_v23  ;;  %1755 = vmatpush3.bf16.msra.mxu1 %v1754_v26 }
 0x189   :  { %1725 = vmatprep.subr.bf16.mxu0 %v1724_v30  ;;  %1757 = vmatprep.subr.bf16.mxu1 %v1756_v34 }
 0x18c   :  { %1727 = vmatpush3.bf16.msra.mxu0 %v1726_v35  ;;  %1759 = vmatpush3.bf16.msra.mxu1 %v1758_v38 }
 0x18d   :  { %1729 = vmatprep.subr.bf16.mxu0 %v1728_v41  ;;  %1761 = vmatprep.subr.bf16.mxu1 %v1760_v45 }
 0x190   :  { %1731 = vmatpush3.bf16.msra.mxu0 %v1730_v46  ;;  %1763 = vmatpush3.bf16.msra.mxu1 %v1762_v49 }
 0x191   :  { %1733 = vmatprep.subr.bf16.mxu0 %v1732_v53  ;;  %1765 = vmatprep.subr.bf16.mxu1 %v1764_v57 }
 0x194   :  { %1735 = vmatpush3.bf16.msra.mxu0 %v1734_v58  ;;  %1767 = vmatpush3.bf16.msra.mxu1 %v1766_v61 }
 0x24a   :  { %v858_v62 = vpop.f32.mrb[2].mxu0  ;;  %v1000_v63 = vpop.f32.mrb[2].mxu1 }
 0x24b   :  { %v1246_v0 = vmul.f32 -1.442695, %v858_v62  ;;  %v1248_v1 = vmul.f32 -1.442695, %v1000_v63  ;;  %v860_v2 = vpop.f32.mrb[3].mxu0  ;;  %v1002_v4 = vpop.f32.mrb[3].mxu1 }
 0x24c   :  { %v1247_v5 = vmul.f32 -1.442695, %v860_v2  ;;  %v1249_v6 = vmul.f32 -1.442695, %v1002_v4 }
 0x24d   :  { %1793 = vpow2.f32 %v1246_v0 }
 0x24e   :  { %1795 = vpow2.f32 %v1248_v1 }
 0x24f   :  { %1797 = vpow2.f32 %v1247_v5 }
 0x250   :  { %1799 = vpow2.f32 %v1249_v6 }
 0x257   :  { %v1794_v7 = vpop.eup %1793 }
 0x258   :  { %v1796_v8 = vpop.eup %1795  ;;  %v1017_v9 = vadd.f32 1.0, %v1794_v7 }
 0x259   :  { %v1798_v10 = vpop.eup %1797  ;;  %v1019_v3 = vadd.f32 1.0, %v1796_v8 }
 0x25a   :  { %v1800_v11 = vpop.eup %1799  ;;  %1801 = vrcp.f32 %v1017_v9  ;;  %v1018_v12 = vadd.f32 1.0, %v1798_v10 }
 0x25b   :  { %1803 = vrcp.f32 %v1019_v3  ;;  %v1020_v13 = vadd.f32 1.0, %v1800_v11 }
 0x25c   :  { %1805 = vrcp.f32 %v1018_v12 }
 0x25d   :  { %1807 = vrcp.f32 %v1020_v13 }
 0x264   :  { %v1802_v15 = vpop.eup %1801 }
 0x265   :  { %v1804_v16 = vpop.eup %1803  ;;  %v1029_v20 = vmul.f32 %v1802_v15, %v858_v62 }
 0x266   :  { %v1806_v17 = vpop.eup %1805  ;;  %v1031_v22 = vmul.f32 %v1804_v16, %v1000_v63 }
 0x267   :  { %v1808_v18 = vpop.eup %1807  ;;  %v1030_v19 = vmul.f32 %v1806_v17, %v860_v2 }
 0x268   :  { %v1032_v21 = vmul.f32 %v1808_v18, %v1002_v4 }
 0x269   :  { %1161 = vmatprep.mubr.f32.mxu0 %v1030_v19 }
 0x26a   :  { %1231 = vmatprep.mubr.f32.mxu1 %v1032_v21  ;;  %1162 = vmatmul.mubr.f32.vlgmr.msra.gmra.mrb[4].mxu0 %v1029_v20 }
 0x26b   :  { %1232 = vmatmul.mubr.f32.vlgmr.msra.gmra.mrb[4].mxu1 %v1031_v22 }
 0x33d   :  { %v1282_v23 = vpop.f32.mrb[4].mxu0 }
 0x33e   :  { %v1317_v24 = vpop.f32.mrb[4].mxu1  ;;  %v1283_v25 = vpop.f32.mrb[5].mxu0 }
 0x33f   :  { %v1284_v26 = vadd.f32 %v1283_v25, %v1282_v23  ;;  %v1318_v27 = vpop.f32.mrb[5].mxu1 }
 0x340   :  { %v1319_v28 = vadd.f32 %v1318_v27, %v1317_v24 }
 0x342   :  { %v1234_v29 = vadd.f32 %v1319_v28, %v1284_v26 }
 0x344   :  { %1237 = vst [vmem:[%s3212_s6] sm:$0xff] %v1234_v29 }

</bundles_post_ra>
